<compile_context>
chip_gen: v7x
topology: tpu7x:2x2x1
jax: 0.10.0
libtpu: 0.0.40
codegen_flags: <defaults>
</compile_context>

<pallas_src>
import math
import functools

import jax
import jax.numpy as jnp
from jax import lax
from jax.experimental import pallas as pl
from jax.experimental.pallas import tpu as pltpu


# ---------------------------------------------------------------------------
# Parameter setup (glue, plain JAX): gaussian orthogonal random features matrix
# ---------------------------------------------------------------------------
def gaussian_orthogonal_random_matrix(key, nrows, ncols, scaling=0, dtype=jnp.float32):
    nb_full_blocks = nrows // ncols
    keys = jax.random.split(key, nb_full_blocks + 2)
    blocks = []
    for i in range(nb_full_blocks):
        unstructured = jax.random.normal(keys[i], (ncols, ncols), dtype=jnp.float32)
        q, _ = jnp.linalg.qr(unstructured)
        blocks.append(q.T)
    remaining = nrows - nb_full_blocks * ncols
    if remaining > 0:
        unstructured = jax.random.normal(keys[nb_full_blocks], (ncols, ncols), dtype=jnp.float32)
        q, _ = jnp.linalg.qr(unstructured)
        blocks.append(q.T[:remaining])
    final = jnp.concatenate(blocks, axis=0)
    if scaling == 0:
        multiplier = jnp.linalg.norm(
            jax.random.normal(keys[-1], (nrows, ncols), dtype=jnp.float32), axis=1)
    elif scaling == 1:
        multiplier = math.sqrt(float(ncols)) * jnp.ones((nrows,), dtype=jnp.float32)
    else:
        raise ValueError("Invalid scaling")
    return (multiplier[:, None] * final).astype(dtype)


def _choose_tile(n, max_tile):
    """Return (tile, n_blocks). Prefer a multiple-of-8 divisor of n <= max_tile;
    otherwise fall back to a cdiv grid with a ragged tail block."""
    if n <= max_tile:
        return n, 1
    for cand in range(max_tile, 7, -1):
        if cand % 8 == 0 and n % cand == 0:
            return cand, n // cand
    tile = max_tile - (max_tile % 8)
    return tile, (n + tile - 1) // tile


# ---------------------------------------------------------------------------
# Pallas kernel
# ---------------------------------------------------------------------------
def _performer_kernel(q_ref, k_ref, v_ref, proj_ref, out_ref,
                      ksum_ref, ctx_acc_ref, ctx_mm_ref, vsum_ref, m_ref,
                      *, H, E, D, M, M_pad, S, n_kv,
                      data_normalizer, softmax_eps, normalization_eps, mm_dtype):
    """
    q_ref:    (tq, H*E)        k_ref: (ts, H*E)       v_ref: (ts, H*D)
    proj_ref: (M_pad, E) in mm_dtype, already scaled by data_normalizer
    out_ref:  (tq, H*D)

    Scratch (persists along the j axis, re-initialized at j == 0 per batch elem):
    ksum_ref:    (H, 1, M_pad) f32  running sum of exp(k_dash - diag - m_run);
                                    finalized to ratio*(sum + S*eps) on last chunk
    ctx_acc_ref: (H, M_pad, D) f32  running sum_s exp(...)*v
    ctx_mm_ref:  (H, M_pad, D) mm   finalized ratio*(ctx_acc + eps*vsum)
    vsum_ref:    (H, 1, D)     f32  running sum_s v
    m_ref:       (H, 1, 1)     f32  running max of k_dash (key stabilizer)
    """
    ts = k_ref.shape[0]

    ratio = M ** -0.5
    log_ratio = -0.5 * math.log(M)            # ln(ratio)
    eps_term = ratio * softmax_eps            # ratio * eps
    half_dn2 = 0.5 * data_normalizer * data_normalizer
    neg_big = -1e30
    need_lane_mask = M < M_pad
    need_row_mask = (n_kv * ts) != S          # ragged K/V tail

    contract_last = (((1,), (1,)), ((), ()))   # contract last dim of both operands
    contract_first = (((0,), (0,)), ((), ()))  # contract first dim of both operands

    j = pl.program_id(1)
    proj = proj_ref[...]                       # (M_pad, E), already mm_dtype & scaled

    lane_valid = None
    if need_lane_mask:
        lane_valid = lax.broadcasted_iota(jnp.int32, (1, M_pad), 1) < M

    # ---------------- per-batch-element init ----------------
    @pl.when(j == 0)
    def _():
        ksum_ref[...] = jnp.zeros_like(ksum_ref)
        ctx_acc_ref[...] = jnp.zeros_like(ctx_acc_ref)
        vsum_ref[...] = jnp.zeros_like(vsum_ref)
        m_ref[...] = jnp.full_like(m_ref, neg_big)

    # ---------------- key/value streaming phase ----------------
    @pl.when(j < n_kv)
    def _():
        if need_row_mask:
            row_ids = lax.broadcasted_iota(jnp.int32, (ts, 1), 0) + j * ts
            row_valid = row_ids < S
        for h in range(H):                                   # static unroll over heads
            k_h = k_ref[:, h * E:(h + 1) * E].astype(jnp.float32)         # (ts, E)
            v_h = v_ref[:, h * D:(h + 1) * D].astype(jnp.float32)         # (ts, D)
            if need_row_mask:
                v_h = jnp.where(row_valid, v_h, 0.0)
            k_dash = lax.dot_general(k_h.astype(mm_dtype), proj, contract_last,
                                     preferred_element_type=jnp.float32)  # (ts, M_pad)
            diag_k = half_dn2 * jnp.sum(k_h * k_h, axis=-1, keepdims=True)

            kd_for_max = k_dash
            if need_lane_mask:
                kd_for_max = jnp.where(lane_valid, kd_for_max, neg_big)
            if need_row_mask:
                kd_for_max = jnp.where(row_valid, kd_for_max, neg_big)

            # NOTE: key stabilizer is per (batch, head) rather than global over the
            # whole batch as in the original module; it only affects the tiny eps term.
            m_old = m_ref[h]                                  # (1, 1)
            m_new = jnp.maximum(m_old, jnp.max(kd_for_max))   # (1, 1)
            alpha = jnp.exp(m_old - m_new)                    # running-max rescale

            p = jnp.exp(k_dash - diag_k - m_new)              # (ts, M_pad) f32
            if need_row_mask:
                p = jnp.where(row_valid, p, 0.0)

            ksum_ref[h] = alpha * ksum_ref[h] + jnp.sum(p, axis=0, keepdims=True)
            ctx_acc_ref[h] = alpha * ctx_acc_ref[h] + lax.dot_general(
                p.astype(mm_dtype), v_h.astype(mm_dtype), contract_first,
                preferred_element_type=jnp.float32)           # (M_pad, D)
            vsum_ref[h] = vsum_ref[h] + jnp.sum(v_h, axis=0, keepdims=True)
            m_ref[h] = m_new

    # ---------------- finalize key-side stats on the last chunk ----------------
    @pl.when(j == n_kv - 1)
    def _():
        for h in range(H):
            ksum_ref[h] = ratio * (ksum_ref[h] + S * softmax_eps)
            ctx_mm_ref[h] = (ratio * (ctx_acc_ref[h]
                                      + softmax_eps * vsum_ref[h])).astype(mm_dtype)

    # ---------------- query phase ----------------
    @pl.when(j >= n_kv)
    def _():
        for h in range(H):                                    # static unroll over heads
            q_h = q_ref[:, h * E:(h + 1) * E].astype(jnp.float32)          # (tq, E)
            q_dash = lax.dot_general(q_h.astype(mm_dtype), proj, contract_last,
                                     preferred_element_type=jnp.float32)   # (tq, M_pad)
            diag_q = half_dn2 * jnp.sum(q_h * q_h, axis=-1, keepdims=True)

            qd_for_max = q_dash
            if need_lane_mask:
                qd_for_max = jnp.where(lane_valid, q_dash, neg_big)
            q_stab = jnp.max(qd_for_max, axis=-1, keepdims=True)            # per-row

            phi_q = jnp.exp(q_dash - diag_q - q_stab + log_ratio) + eps_term
            if need_lane_mask:
                phi_q = jnp.where(lane_valid, phi_q, 0.0)     # zero padded features

            # Denominator on VPU/XLU; reciprocal on the EUP + one Newton step.
            denom = jnp.sum(phi_q * ksum_ref[h], axis=-1, keepdims=True) + normalization_eps
            d_inv = pl.reciprocal(denom, approx=True)
            d_inv = d_inv * (2.0 - denom * d_inv)

            out_h = jnp.dot(phi_q.astype(mm_dtype), ctx_mm_ref[h],
                            preferred_element_type=jnp.float32)            # (tq, D)
            out_ref[:, h * D:(h + 1) * D] = (out_h * d_inv).astype(out_ref.dtype)


# ---------------------------------------------------------------------------
# Module-equivalent wrapper
# ---------------------------------------------------------------------------
class PerformerAttentionPallas:
    def __init__(self, dim_heads, nb_features=None, ortho_scaling=0,
                 softmax_temp=None, softmax_eps=1e-4, normalization_eps=1e-6,
                 mxu_bf16=True, q_tile=512, kv_tile=512, seed=0, dtype=jnp.float32):
        self.dim_heads = dim_heads
        # Tip: nb_features that is a multiple of 128 avoids padded-lane exp work.
        self.nb_features = (nb_features if nb_features is not None
                            else int(dim_heads * math.log(dim_heads)))
        self.nb_features_padded = ((self.nb_features + 127) // 128) * 128
        self.softmax_temp = softmax_temp
        self.softmax_eps = softmax_eps
        self.normalization_eps = normalization_eps
        self.mxu_bf16 = mxu_bf16
        self.mm_dtype = jnp.bfloat16 if mxu_bf16 else jnp.float32
        self.q_tile = q_tile
        self.kv_tile = kv_tile

        self.projection_matrix = gaussian_orthogonal_random_matrix(
            jax.random.PRNGKey(seed), self.nb_features, dim_heads,
            scaling=ortho_scaling, dtype=dtype)

        # Hoist: pad to a lane multiple, fold in data_normalizer, cast to MXU dtype.
        st = softmax_temp if softmax_temp is not None else 1.0 / math.sqrt(dim_heads)
        self.data_normalizer = math.sqrt(st)
        pad = self.nb_features_padded - self.nb_features
        proj_padded = (jnp.pad(self.projection_matrix, ((0, pad), (0, 0)))
                       if pad else self.projection_matrix)
        self._proj_mm = (proj_padded.astype(jnp.float32)
                         * self.data_normalizer).astype(self.mm_dtype)

    def __call__(self, query, key, value):
        """query (B,T,H,E), key (B,S,H,E), value (B,S,H,D) -> (out (B,T,H,D), None)"""
        B, T, H, E = query.shape
        _, S, _, D = value.shape
        assert E == self.dim_heads
        M, M_pad = self.nb_features, self.nb_features_padded

        # Free, contiguous reshapes -- no HBM transposes around the kernel.
        q2 = query.reshape(B, T, H * E)
        k2 = key.reshape(B, S, H * E)
        v2 = value.reshape(B, S, H * D)

        tq, n_q = _choose_tile(T, self.q_tile)
        ts, n_kv = _choose_tile(S, self.kv_tile)

        kernel = functools.partial(
            _performer_kernel, H=H, E=E, D=D, M=M, M_pad=M_pad, S=S, n_kv=n_kv,
            data_normalizer=self.data_normalizer, softmax_eps=self.softmax_eps,
            normalization_eps=self.normalization_eps, mm_dtype=self.mm_dtype)

        # VMEM budget sized from actual tile bytes, capped by the chip's capacity.
        in_bytes = jnp.dtype(query.dtype).itemsize
        mm_bytes = jnp.dtype(self.mm_dtype).itemsize
        est = (2 * (tq * H * E + ts * H * E + ts * H * D + tq * H * D) * in_bytes
               + 2 * M_pad * E * mm_bytes
               + H * 8 * M_pad * 4 + H * M_pad * D * (4 + mm_bytes)
               + H * 8 * D * 4 + H * 8 * 128 * 4
               + 4 * (ts + tq) * M_pad * 4)
        try:
            cap = int(pltpu.get_tpu_info().vmem_capacity_bytes)
        except Exception:
            cap = 64 << 20
        vmem_limit = int(min(max(2 * est, 32 << 20), cap * 3 // 4))

        out2 = pl.pallas_call(
            kernel,
            grid=(B, n_kv + n_q),
            in_specs=[
                # Query tile: pinned to tile 0 during the K/V phase.
                pl.BlockSpec((None, tq, H * E),
                             lambda b, j: (b, jnp.maximum(j - n_kv, 0), 0)),
                # K/V chunks: streamed during the key phase, pinned afterwards
                # (index constant => no extra DMAs during the query phase).
                pl.BlockSpec((None, ts, H * E),
                             lambda b, j: (b, jnp.minimum(j, n_kv - 1), 0)),
                pl.BlockSpec((None, ts, H * D),
                             lambda b, j: (b, jnp.minimum(j, n_kv - 1), 0)),
                pl.BlockSpec((M_pad, E), lambda b, j: (0, 0)),
            ],
            out_specs=pl.BlockSpec((None, tq, H * D),
                                   lambda b, j: (b, jnp.maximum(j - n_kv, 0), 0)),
            out_shape=jax.ShapeDtypeStruct((B, T, H * D), query.dtype),
            scratch_shapes=[
                pltpu.VMEM((H, 1, M_pad), jnp.float32),    # ksum (running -> final)
                pltpu.VMEM((H, M_pad, D), jnp.float32),    # ctx accumulator (f32)
                pltpu.VMEM((H, M_pad, D), self.mm_dtype),  # finalized ctx (MXU dtype)
                pltpu.VMEM((H, 1, D), jnp.float32),        # sum of v (eps term)
                pltpu.VMEM((H, 1, 1), jnp.float32),        # running key stabilizer
            ],
            compiler_params=pltpu.CompilerParams(
                dimension_semantics=("parallel", "arbitrary"),
                vmem_limit_bytes=vmem_limit),
        )(q2, k2, v2, self._proj_mm)

        out = out2.reshape(B, T, H, D)
        # TODO(synk): need_weights=True (explicit attention matrix), causal attn_mask,
        # key_padding_mask, generalized_attention and no_projection paths are not
        # implemented.
        # TODO(synk): on v7x with B < 2 only one TensorCore gets work (B is the only
        # "parallel" axis); a split key/query two-kernel variant would fix that.
        return out, None


# ---------------------------------------------------------------------------
# Pure-JAX reference (same math) for a correctness sanity check
# ---------------------------------------------------------------------------
def _reference(query, key, value, proj, softmax_temp, softmax_eps, normalization_eps):
    q = jnp.transpose(query, (0, 2, 1, 3)).astype(jnp.float32)
    k = jnp.transpose(key, (0, 2, 1, 3)).astype(jnp.float32)
    v = jnp.transpose(value, (0, 2, 1, 3)).astype(jnp.float32)
    dn = math.sqrt(softmax_temp)
    ratio = proj.shape[0] ** -0.5

    def feat(x, is_query):
        x_dash = jnp.einsum('bhie,me->bhim', dn * x, proj.astype(jnp.float32))
        diag = jnp.sum(x * x, axis=-1, keepdims=True) * 0.5 * dn * dn
        if is_query:
            stab = jnp.max(x_dash, axis=-1, keepdims=True)
        else:
            stab = jnp.max(x_dash, axis=(-1, -2), keepdims=True)
        return ratio * (jnp.exp(x_dash - diag - stab) + softmax_eps)

    pq, pk = feat(q, True), feat(k, False)
    k_sum = jnp.sum(pk, axis=-2)
    d_inv = 1.0 / (jnp.einsum('bhtm,bhm->bht', pq, k_sum) + normalization_eps)
    context = jnp.einsum('bhsm,bhsd->bhmd', pk, v)
    out = jnp.einsum('bhmd,bhtm,bht->bhtd', context, pq, d_inv)
    return jnp.transpose(out, (0, 2, 1, 3))


if __name__ == "__main__":
    def run_case(B, T, S, H, E, D, bf16_tol, seed=0):
        key = jax.random.PRNGKey(0)
        kq, kk, kv = jax.random.split(key, 3)
        query = jax.random.normal(kq, (B, T, H, E), dtype=jnp.float32)
        key_t = jax.random.normal(kk, (B, S, H, E), dtype=jnp.float32)
        value = jax.random.normal(kv, (B, S, H, D), dtype=jnp.float32)

        # f32 path: matches the PyTorch module's numerics.
        attn_f32 = PerformerAttentionPallas(dim_heads=E, seed=seed, mxu_bf16=False)
        out_f32, attn_w = attn_f32(query, key_t, value)
        out_f32 = jax.block_until_ready(out_f32)
        assert attn_w is None

        ref = _reference(query, key_t, value, attn_f32.projection_matrix,
                         softmax_temp=1.0 / math.sqrt(E),
                         softmax_eps=attn_f32.softmax_eps,
                         normalization_eps=attn_f32.normalization_eps)
        assert out_f32.shape == (B, T, H, D)
        assert bool(jnp.allclose(out_f32, ref, atol=1e-2, rtol=1e-2)), \
            "f32 kernel mismatch vs reference"

        # Default path: bf16 MXU operands, f32 accumulation/stabilization.
        attn_bf16 = PerformerAttentionPallas(dim_heads=E, seed=seed)
        out_bf16, _ = attn_bf16(query, key_t, value)
        out_bf16 = jax.block_until_ready(out_bf16)
        assert out_bf16.shape == (B, T, H, D)
        assert bool(jnp.all(jnp.isfinite(out_bf16)))
        assert float(jnp.max(jnp.abs(out_bf16 - ref))) < bf16_tol, \
            "bf16 kernel too far from reference"

    # Small case (dim_heads=16 -> nb_features=44, padded to 128); single K/V chunk.
    run_case(B=2, T=8, S=8, H=2, E=16, D=16, bf16_tol=0.25)
    # Larger case: exercises the streamed K/V phase (2 chunks) and query tiling.
    run_case(B=1, T=1024, S=1024, H=2, E=16, D=16, bf16_tol=0.5)

    print("KERNEL_OK")
</pallas_src>

<mosaic_0001>
module attributes {stable_mosaic.version = 11 : i64} {
  func.func @_performer_kernel(%arg0: i32, %arg1: i32, %arg2: memref<1x8x32xf32, #tpu.memory_space<vmem>>, %arg3: memref<1x8x32xf32, #tpu.memory_space<vmem>>, %arg4: memref<1x8x32xf32, #tpu.memory_space<vmem>>, %arg5: memref<128x16xf32, #tpu.memory_space<vmem>>, %arg6: memref<1x8x32xf32, #tpu.memory_space<vmem>>, %arg7: memref<2x1x128xf32, #tpu.memory_space<vmem>>, %arg8: memref<2x128x16xf32, #tpu.memory_space<vmem>>, %arg9: memref<2x128x16xf32, #tpu.memory_space<vmem>>, %arg10: memref<2x1x16xf32, #tpu.memory_space<vmem>>, %arg11: memref<2x1x1xf32, #tpu.memory_space<vmem>>) attributes {dimension_semantics = [#tpu.dimension_semantics<parallel>, #tpu.dimension_semantics<arbitrary>], iteration_bounds = array<i64: 2, 2>, scalar_prefetch = 0 : i64, scratch_operands = 5 : i64, tpu.core_type = #tpu.core_type<tc>, window_params = [{transform_indices = @transform_0, window_bounds = array<i64: 1, 8, 32>}, {transform_indices = @transform_1, window_bounds = array<i64: 1, 8, 32>}, {transform_indices = @transform_2, window_bounds = array<i64: 1, 8, 32>}, {pipeline_mode = #tpu.pipeline_mode<synchronous>, transform_indices = @transform_3, window_bounds = array<i64: 128, 16>}, {transform_indices = @transform_4, window_bounds = array<i64: 1, 8, 32>}]} {
    %c0 = arith.constant 0 : index
    %c0_0 = arith.constant 0 : index
    %0 = vector.load %arg5[%c0, %c0_0] : memref<128x16xf32, #tpu.memory_space<vmem>>, vector<128x16xf32>
    %1 = tpu.iota {dimensions = array<i32: 1>} : vector<1x128xi32>
    %c44_i32 = arith.constant 44 : i32
    %2 = vector.broadcast %c44_i32 : i32 to vector<1x128xi32>
    %3 = arith.cmpi slt, %1, %2 : vector<1x128xi32>
    %c0_i32 = arith.constant 0 : i32
    %4 = arith.cmpi eq, %arg1, %c0_i32 : i32
    %5 = arith.extui %4 : i1 to i32
    %c0_i32_1 = arith.constant 0 : i32
    %6 = arith.cmpi ne, %5, %c0_i32_1 : i32
    scf.if %6 {
      %cst = arith.constant 0.000000e+00 : f32
      %16 = vector.broadcast %cst : f32 to vector<2x1x128xf32>
      %c0_7 = arith.constant 0 : index
      %c0_8 = arith.constant 0 : index
      %c0_9 = arith.constant 0 : index
      %17 = vector.load %arg7[%c0_7, %c0_8, %c0_9] : memref<2x1x128xf32, #tpu.memory_space<vmem>>, vector<2x1x128xf32>
      tpu.vector_store %arg7[%c0_7, %c0_8, %c0_9], %16 {strides = array<i32>} : memref<2x1x128xf32, #tpu.memory_space<vmem>>, vector<2x1x128xf32>,
      %cst_10 = arith.constant 0.000000e+00 : f32
      %18 = vector.broadcast %cst_10 : f32 to vector<2x128x16xf32>
      %c0_11 = arith.constant 0 : index
      %c0_12 = arith.constant 0 : index
      %c0_13 = arith.constant 0 : index
      %19 = vector.load %arg8[%c0_11, %c0_12, %c0_13] : memref<2x128x16xf32, #tpu.memory_space<vmem>>, vector<2x128x16xf32>
      tpu.vector_store %arg8[%c0_11, %c0_12, %c0_13], %18 {strides = array<i32>} : memref<2x128x16xf32, #tpu.memory_space<vmem>>, vector<2x128x16xf32>,
      %cst_14 = arith.constant 0.000000e+00 : f32
      %20 = vector.broadcast %cst_14 : f32 to vector<2x1x16xf32>
      %c0_15 = arith.constant 0 : index
      %c0_16 = arith.constant 0 : index
      %c0_17 = arith.constant 0 : index
      %21 = vector.load %arg10[%c0_15, %c0_16, %c0_17] : memref<2x1x16xf32, #tpu.memory_space<vmem>>, vector<2x1x16xf32>
      tpu.vector_store %arg10[%c0_15, %c0_16, %c0_17], %20 {strides = array<i32>} : memref<2x1x16xf32, #tpu.memory_space<vmem>>, vector<2x1x16xf32>,
      %cst_18 = arith.constant -1.000000e+30 : f32
      %22 = vector.broadcast %cst_18 : f32 to vector<2x1x1xf32>
      %c0_19 = arith.constant 0 : index
      %c0_20 = arith.constant 0 : index
      %c0_21 = arith.constant 0 : index
      %23 = vector.load %arg11[%c0_19, %c0_20, %c0_21] : memref<2x1x1xf32, #tpu.memory_space<vmem>>, vector<2x1x1xf32>
      tpu.vector_store %arg11[%c0_19, %c0_20, %c0_21], %22 {strides = array<i32>} : memref<2x1x1xf32, #tpu.memory_space<vmem>>, vector<2x1x1xf32>,
    } else {
    }
    %c1_i32 = arith.constant 1 : i32
    %7 = arith.cmpi slt, %arg1, %c1_i32 : i32
    %8 = arith.extui %7 : i1 to i32
    %c0_i32_2 = arith.constant 0 : i32
    %9 = arith.cmpi ne, %8, %c0_i32_2 : i32
    scf.if %9 {
      %c0_7 = arith.constant 0 : index
      %c0_8 = arith.constant 0 : index
      %c0_9 = arith.constant 0 : index
      %16 = vector.load %arg3[%c0_7, %c0_8, %c0_9] : memref<1x8x32xf32, #tpu.memory_space<vmem>>, vector<1x8x16xf32>
      %17 = vector.shape_cast %16 : vector<1x8x16xf32> to vector<8x16xf32>
      %c0_10 = arith.constant 0 : index
      %c0_11 = arith.constant 0 : index
      %c0_12 = arith.constant 0 : index
      %18 = vector.load %arg4[%c0_10, %c0_11, %c0_12] : memref<1x8x32xf32, #tpu.memory_space<vmem>>, vector<1x8x16xf32>
      %19 = vector.shape_cast %18 : vector<1x8x16xf32> to vector<8x16xf32>
      %cst = arith.constant dense<0.000000e+00> : vector<8x128xf32>
      %20 = tpu.matmul %17, %0, %cst {dimension_numbers = #tpu.dot_dimension_numbers<[1], [1], [0], [0], [0, 0, 1, 0], [], []>} : vector<8x16xf32>, vector<128x16xf32>, vector<8x128xf32> -> vector<8x128xf32>
      %21 = arith.mulf %17, %17 : vector<8x16xf32>
      %cst_13 = arith.constant dense<0.000000e+00> : vector<8xf32>
      %22 = vector.multi_reduction <add>, %21, %cst_13 [1] : vector<8x16xf32> to vector<8xf32>
      %23 = vector.shape_cast %22 : vector<8xf32> to vector<8x1xf32>
      %cst_14 = arith.constant 1.250000e-01 : f32
      %24 = vector.broadcast %cst_14 : f32 to vector<8x1xf32>
      %25 = arith.mulf %24, %23 : vector<8x1xf32>
      %cst_15 = arith.constant -1.000000e+30 : f32
      %26 = vector.shape_cast %3 : vector<1x128xi1> to vector<1x128xi1>
      %27 = vector.broadcast %26 : vector<1x128xi1> to vector<8x128xi1>
      %28 = vector.broadcast %cst_15 : f32 to vector<8x128xf32>
      %29 = arith.select %27, %20, %28 : vector<8x128xi1>, vector<8x128xf32>
      %c0_16 = arith.constant 0 : index
      %c0_17 = arith.constant 0 : index
      %c0_18 = arith.constant 0 : index
      %30 = vector.load %arg11[%c0_16, %c0_17, %c0_18] : memref<2x1x1xf32, #tpu.memory_space<vmem>>, vector<1x1x1xf32>
      %31 = vector.shape_cast %30 : vector<1x1x1xf32> to vector<1x1xf32>
      %32 = vector.shape_cast %29 : vector<8x128xf32> to vector<1x8x128xf32>
      %cst_19 = arith.constant dense<0xFF800000> : vector<1xf32>
      %33 = vector.multi_reduction <maximumf>, %32, %cst_19 [1, 2] : vector<1x8x128xf32> to vector<1xf32>
      %34 = vector.shape_cast %33 : vector<1xf32> to vector<1x1x1xf32>
      %35 = vector.extract %34[0, 0, 0] : f32 from vector<1x1x1xf32>
      %36 = vector.broadcast %35 : f32 to vector<1x1xf32>
      %37 = arith.maximumf %31, %36 : vector<1x1xf32>
      %38 = arith.subf %31, %37 : vector<1x1xf32>
      %39 = math.exp %38 : vector<1x1xf32>
      %40 = vector.broadcast %25 : vector<8x1xf32> to vector<8x128xf32>
      %41 = arith.subf %20, %40 : vector<8x128xf32>
      %42 = vector.broadcast %37 : vector<1x1xf32> to vector<8x128xf32>
      %43 = arith.subf %41, %42 : vector<8x128xf32>
      %44 = math.exp %43 : vector<8x128xf32>
      %c0_20 = arith.constant 0 : index
      %c0_21 = arith.constant 0 : index
      %c0_22 = arith.constant 0 : index
      %45 = vector.load %arg7[%c0_20, %c0_21, %c0_22] : memref<2x1x128xf32, #tpu.memory_space<vmem>>, vector<1x1x128xf32>
      %46 = vector.shape_cast %45 : vector<1x1x128xf32> to vector<1x128xf32>
      %47 = vector.broadcast %39 : vector<1x1xf32> to vector<1x128xf32>
      %48 = arith.mulf %47, %46 : vector<1x128xf32>
      %cst_23 = arith.constant dense<0.000000e+00> : vector<128xf32>
      %49 = vector.multi_reduction <add>, %44, %cst_23 [0] : vector<8x128xf32> to vector<128xf32>
      %50 = vector.shape_cast %49 : vector<128xf32> to vector<1x128xf32>
      %51 = arith.addf %48, %50 : vector<1x128xf32>
      %c0_24 = arith.constant 0 : index
      %c0_25 = arith.constant 0 : index
      %c0_26 = arith.constant 0 : index
      %52 = vector.load %arg7[%c0_24, %c0_25, %c0_26] : memref<2x1x128xf32, #tpu.memory_space<vmem>>, vector<1x1x128xf32>
      %53 = vector.shape_cast %52 : vector<1x1x128xf32> to vector<1x128xf32>
      %54 = vector.shape_cast %51 : vector<1x128xf32> to vector<1x1x128xf32>
      tpu.vector_store %arg7[%c0_24, %c0_25, %c0_26], %54 {strides = array<i32>} : memref<2x1x128xf32, #tpu.memory_space<vmem>>, vector<1x1x128xf32>,
      %c0_27 = arith.constant 0 : index
      %c0_28 = arith.constant 0 : index
      %c0_29 = arith.constant 0 : index
      %55 = vector.load %arg8[%c0_27, %c0_28, %c0_29] : memref<2x128x16xf32, #tpu.memory_space<vmem>>, vector<1x128x16xf32>
      %56 = vector.shape_cast %55 : vector<1x128x16xf32> to vector<128x16xf32>
      %57 = vector.broadcast %39 : vector<1x1xf32> to vector<128x16xf32>
      %58 = arith.mulf %57, %56 : vector<128x16xf32>
      %cst_30 = arith.constant dense<0.000000e+00> : vector<128x16xf32>
      %59 = tpu.matmul %44, %19, %cst_30 {dimension_numbers = #tpu.dot_dimension_numbers<[0], [0], [1], [1], [0, 1, 1, 1], [], []>} : vector<8x128xf32>, vector<8x16xf32>, vector<128x16xf32> -> vector<128x16xf32>
      %60 = arith.addf %58, %59 : vector<128x16xf32>
      %c0_31 = arith.constant 0 : index
      %c0_32 = arith.constant 0 : index
      %c0_33 = arith.constant 0 : index
      %61 = vector.load %arg8[%c0_31, %c0_32, %c0_33] : memref<2x128x16xf32, #tpu.memory_space<vmem>>, vector<1x128x16xf32>
      %62 = vector.shape_cast %61 : vector<1x128x16xf32> to vector<128x16xf32>
      %63 = vector.shape_cast %60 : vector<128x16xf32> to vector<1x128x16xf32>
      tpu.vector_store %arg8[%c0_31, %c0_32, %c0_33], %63 {strides = array<i32>} : memref<2x128x16xf32, #tpu.memory_space<vmem>>, vector<1x128x16xf32>,
      %c0_34 = arith.constant 0 : index
      %c0_35 = arith.constant 0 : index
      %c0_36 = arith.constant 0 : index
      %64 = vector.load %arg10[%c0_34, %c0_35, %c0_36] : memref<2x1x16xf32, #tpu.memory_space<vmem>>, vector<1x1x16xf32>
      %65 = vector.shape_cast %64 : vector<1x1x16xf32> to vector<1x16xf32>
      %cst_37 = arith.constant dense<0.000000e+00> : vector<16xf32>
      %66 = vector.multi_reduction <add>, %19, %cst_37 [0] : vector<8x16xf32> to vector<16xf32>
      %67 = vector.shape_cast %66 : vector<16xf32> to vector<1x16xf32>
      %68 = arith.addf %65, %67 : vector<1x16xf32>
      %c0_38 = arith.constant 0 : index
      %c0_39 = arith.constant 0 : index
      %c0_40 = arith.constant 0 : index
      %69 = vector.load %arg10[%c0_38, %c0_39, %c0_40] : memref<2x1x16xf32, #tpu.memory_space<vmem>>, vector<1x1x16xf32>
      %70 = vector.shape_cast %69 : vector<1x1x16xf32> to vector<1x16xf32>
      %71 = vector.shape_cast %68 : vector<1x16xf32> to vector<1x1x16xf32>
      tpu.vector_store %arg10[%c0_38, %c0_39, %c0_40], %71 {strides = array<i32>} : memref<2x1x16xf32, #tpu.memory_space<vmem>>, vector<1x1x16xf32>,
      %c0_41 = arith.constant 0 : index
      %c0_42 = arith.constant 0 : index
      %c0_43 = arith.constant 0 : index
      %72 = vector.load %arg11[%c0_41, %c0_42, %c0_43] : memref<2x1x1xf32, #tpu.memory_space<vmem>>, vector<1x1x1xf32>
      %73 = vector.shape_cast %72 : vector<1x1x1xf32> to vector<1x1xf32>
      %74 = vector.shape_cast %37 : vector<1x1xf32> to vector<1x1x1xf32>
      tpu.vector_store %arg11[%c0_41, %c0_42, %c0_43], %74 {strides = array<i32>} : memref<2x1x1xf32, #tpu.memory_space<vmem>>, vector<1x1x1xf32>,
      %c0_44 = arith.constant 0 : index
      %c0_45 = arith.constant 0 : index
      %c16 = arith.constant 16 : index
      %75 = vector.load %arg3[%c0_44, %c0_45, %c16] : memref<1x8x32xf32, #tpu.memory_space<vmem>>, vector<1x8x16xf32>
      %76 = vector.shape_cast %75 : vector<1x8x16xf32> to vector<8x16xf32>
      %c0_46 = arith.constant 0 : index
      %c0_47 = arith.constant 0 : index
      %c16_48 = arith.constant 16 : index
      %77 = vector.load %arg4[%c0_46, %c0_47, %c16_48] : memref<1x8x32xf32, #tpu.memory_space<vmem>>, vector<1x8x16xf32>
      %78 = vector.shape_cast %77 : vector<1x8x16xf32> to vector<8x16xf32>
      %cst_49 = arith.constant dense<0.000000e+00> : vector<8x128xf32>
      %79 = tpu.matmul %76, %0, %cst_49 {dimension_numbers = #tpu.dot_dimension_numbers<[1], [1], [0], [0], [0, 0, 1, 0], [], []>} : vector<8x16xf32>, vector<128x16xf32>, vector<8x128xf32> -> vector<8x128xf32>
      %80 = arith.mulf %76, %76 : vector<8x16xf32>
      %cst_50 = arith.constant dense<0.000000e+00> : vector<8xf32>
      %81 = vector.multi_reduction <add>, %80, %cst_50 [1] : vector<8x16xf32> to vector<8xf32>
      %82 = vector.shape_cast %81 : vector<8xf32> to vector<8x1xf32>
      %cst_51 = arith.constant 1.250000e-01 : f32
      %83 = vector.broadcast %cst_51 : f32 to vector<8x1xf32>
      %84 = arith.mulf %83, %82 : vector<8x1xf32>
      %cst_52 = arith.constant -1.000000e+30 : f32
      %85 = vector.shape_cast %3 : vector<1x128xi1> to vector<1x128xi1>
      %86 = vector.broadcast %85 : vector<1x128xi1> to vector<8x128xi1>
      %87 = vector.broadcast %cst_52 : f32 to vector<8x128xf32>
      %88 = arith.select %86, %79, %87 : vector<8x128xi1>, vector<8x128xf32>
      %c1 = arith.constant 1 : index
      %c0_53 = arith.constant 0 : index
      %c0_54 = arith.constant 0 : index
      %89 = vector.load %arg11[%c1, %c0_53, %c0_54] : memref<2x1x1xf32, #tpu.memory_space<vmem>>, vector<1x1x1xf32>
      %90 = vector.shape_cast %89 : vector<1x1x1xf32> to vector<1x1xf32>
      %91 = vector.shape_cast %88 : vector<8x128xf32> to vector<1x8x128xf32>
      %cst_55 = arith.constant dense<0xFF800000> : vector<1xf32>
      %92 = vector.multi_reduction <maximumf>, %91, %cst_55 [1, 2] : vector<1x8x128xf32> to vector<1xf32>
      %93 = vector.shape_cast %92 : vector<1xf32> to vector<1x1x1xf32>
      %94 = vector.extract %93[0, 0, 0] : f32 from vector<1x1x1xf32>
      %95 = vector.broadcast %94 : f32 to vector<1x1xf32>
      %96 = arith.maximumf %90, %95 : vector<1x1xf32>
      %97 = arith.subf %90, %96 : vector<1x1xf32>
      %98 = math.exp %97 : vector<1x1xf32>
      %99 = vector.broadcast %84 : vector<8x1xf32> to vector<8x128xf32>
      %100 = arith.subf %79, %99 : vector<8x128xf32>
      %101 = vector.broadcast %96 : vector<1x1xf32> to vector<8x128xf32>
      %102 = arith.subf %100, %101 : vector<8x128xf32>
      %103 = math.exp %102 : vector<8x128xf32>
      %c1_56 = arith.constant 1 : index
      %c0_57 = arith.constant 0 : index
      %c0_58 = arith.constant 0 : index
      %104 = vector.load %arg7[%c1_56, %c0_57, %c0_58] : memref<2x1x128xf32, #tpu.memory_space<vmem>>, vector<1x1x128xf32>
      %105 = vector.shape_cast %104 : vector<1x1x128xf32> to vector<1x128xf32>
      %106 = vector.broadcast %98 : vector<1x1xf32> to vector<1x128xf32>
      %107 = arith.mulf %106, %105 : vector<1x128xf32>
      %cst_59 = arith.constant dense<0.000000e+00> : vector<128xf32>
      %108 = vector.multi_reduction <add>, %103, %cst_59 [0] : vector<8x128xf32> to vector<128xf32>
      %109 = vector.shape_cast %108 : vector<128xf32> to vector<1x128xf32>
      %110 = arith.addf %107, %109 : vector<1x128xf32>
      %c1_60 = arith.constant 1 : index
      %c0_61 = arith.constant 0 : index
      %c0_62 = arith.constant 0 : index
      %111 = vector.load %arg7[%c1_60, %c0_61, %c0_62] : memref<2x1x128xf32, #tpu.memory_space<vmem>>, vector<1x1x128xf32>
      %112 = vector.shape_cast %111 : vector<1x1x128xf32> to vector<1x128xf32>
      %113 = vector.shape_cast %110 : vector<1x128xf32> to vector<1x1x128xf32>
      tpu.vector_store %arg7[%c1_60, %c0_61, %c0_62], %113 {strides = array<i32>} : memref<2x1x128xf32, #tpu.memory_space<vmem>>, vector<1x1x128xf32>,
      %c1_63 = arith.constant 1 : index
      %c0_64 = arith.constant 0 : index
      %c0_65 = arith.constant 0 : index
      %114 = vector.load %arg8[%c1_63, %c0_64, %c0_65] : memref<2x128x16xf32, #tpu.memory_space<vmem>>, vector<1x128x16xf32>
      %115 = vector.shape_cast %114 : vector<1x128x16xf32> to vector<128x16xf32>
      %116 = vector.broadcast %98 : vector<1x1xf32> to vector<128x16xf32>
      %117 = arith.mulf %116, %115 : vector<128x16xf32>
      %cst_66 = arith.constant dense<0.000000e+00> : vector<128x16xf32>
      %118 = tpu.matmul %103, %78, %cst_66 {dimension_numbers = #tpu.dot_dimension_numbers<[0], [0], [1], [1], [0, 1, 1, 1], [], []>} : vector<8x128xf32>, vector<8x16xf32>, vector<128x16xf32> -> vector<128x16xf32>
      %119 = arith.addf %117, %118 : vector<128x16xf32>
      %c1_67 = arith.constant 1 : index
      %c0_68 = arith.constant 0 : index
      %c0_69 = arith.constant 0 : index
      %120 = vector.load %arg8[%c1_67, %c0_68, %c0_69] : memref<2x128x16xf32, #tpu.memory_space<vmem>>, vector<1x128x16xf32>
      %121 = vector.shape_cast %120 : vector<1x128x16xf32> to vector<128x16xf32>
      %122 = vector.shape_cast %119 : vector<128x16xf32> to vector<1x128x16xf32>
      tpu.vector_store %arg8[%c1_67, %c0_68, %c0_69], %122 {strides = array<i32>} : memref<2x128x16xf32, #tpu.memory_space<vmem>>, vector<1x128x16xf32>,
      %c1_70 = arith.constant 1 : index
      %c0_71 = arith.constant 0 : index
      %c0_72 = arith.constant 0 : index
      %123 = vector.load %arg10[%c1_70, %c0_71, %c0_72] : memref<2x1x16xf32, #tpu.memory_space<vmem>>, vector<1x1x16xf32>
      %124 = vector.shape_cast %123 : vector<1x1x16xf32> to vector<1x16xf32>
      %cst_73 = arith.constant dense<0.000000e+00> : vector<16xf32>
      %125 = vector.multi_reduction <add>, %78, %cst_73 [0] : vector<8x16xf32> to vector<16xf32>
      %126 = vector.shape_cast %125 : vector<16xf32> to vector<1x16xf32>
      %127 = arith.addf %124, %126 : vector<1x16xf32>
      %c1_74 = arith.constant 1 : index
      %c0_75 = arith.constant 0 : index
      %c0_76 = arith.constant 0 : index
      %128 = vector.load %arg10[%c1_74, %c0_75, %c0_76] : memref<2x1x16xf32, #tpu.memory_space<vmem>>, vector<1x1x16xf32>
      %129 = vector.shape_cast %128 : vector<1x1x16xf32> to vector<1x16xf32>
      %130 = vector.shape_cast %127 : vector<1x16xf32> to vector<1x1x16xf32>
      tpu.vector_store %arg10[%c1_74, %c0_75, %c0_76], %130 {strides = array<i32>} : memref<2x1x16xf32, #tpu.memory_space<vmem>>, vector<1x1x16xf32>,
      %c1_77 = arith.constant 1 : index
      %c0_78 = arith.constant 0 : index
      %c0_79 = arith.constant 0 : index
      %131 = vector.load %arg11[%c1_77, %c0_78, %c0_79] : memref<2x1x1xf32, #tpu.memory_space<vmem>>, vector<1x1x1xf32>
      %132 = vector.shape_cast %131 : vector<1x1x1xf32> to vector<1x1xf32>
      %133 = vector.shape_cast %96 : vector<1x1xf32> to vector<1x1x1xf32>
      tpu.vector_store %arg11[%c1_77, %c0_78, %c0_79], %133 {strides = array<i32>} : memref<2x1x1xf32, #tpu.memory_space<vmem>>, vector<1x1x1xf32>,
    } else {
    }
    %c0_i32_3 = arith.constant 0 : i32
    %10 = arith.cmpi eq, %arg1, %c0_i32_3 : i32
    %11 = arith.extui %10 : i1 to i32
    %c0_i32_4 = arith.constant 0 : i32
    %12 = arith.cmpi ne, %11, %c0_i32_4 : i32
    scf.if %12 {
      %c0_7 = arith.constant 0 : index
      %c0_8 = arith.constant 0 : index
      %c0_9 = arith.constant 0 : index
      %16 = vector.load %arg7[%c0_7, %c0_8, %c0_9] : memref<2x1x128xf32, #tpu.memory_space<vmem>>, vector<1x1x128xf32>
      %17 = vector.shape_cast %16 : vector<1x1x128xf32> to vector<1x128xf32>
      %cst = arith.constant 8.000000e-04 : f32
      %18 = vector.broadcast %cst : f32 to vector<1x128xf32>
      %19 = arith.addf %17, %18 : vector<1x128xf32>
      %cst_10 = arith.constant 0.150755674 : f32
      %20 = vector.broadcast %cst_10 : f32 to vector<1x128xf32>
      %21 = arith.mulf %20, %19 : vector<1x128xf32>
      %c0_11 = arith.constant 0 : index
      %c0_12 = arith.constant 0 : index
      %c0_13 = arith.constant 0 : index
      %22 = vector.load %arg7[%c0_11, %c0_12, %c0_13] : memref<2x1x128xf32, #tpu.memory_space<vmem>>, vector<1x1x128xf32>
      %23 = vector.shape_cast %22 : vector<1x1x128xf32> to vector<1x128xf32>
      %24 = vector.shape_cast %21 : vector<1x128xf32> to vector<1x1x128xf32>
      tpu.vector_store %arg7[%c0_11, %c0_12, %c0_13], %24 {strides = array<i32>} : memref<2x1x128xf32, #tpu.memory_space<vmem>>, vector<1x1x128xf32>,
      %c0_14 = arith.constant 0 : index
      %c0_15 = arith.constant 0 : index
      %c0_16 = arith.constant 0 : index
      %25 = vector.load %arg8[%c0_14, %c0_15, %c0_16] : memref<2x128x16xf32, #tpu.memory_space<vmem>>, vector<1x128x16xf32>
      %26 = vector.shape_cast %25 : vector<1x128x16xf32> to vector<128x16xf32>
      %c0_17 = arith.constant 0 : index
      %c0_18 = arith.constant 0 : index
      %c0_19 = arith.constant 0 : index
      %27 = vector.load %arg10[%c0_17, %c0_18, %c0_19] : memref<2x1x16xf32, #tpu.memory_space<vmem>>, vector<1x1x16xf32>
      %28 = vector.shape_cast %27 : vector<1x1x16xf32> to vector<1x16xf32>
      %cst_20 = arith.constant 9.99999974E-5 : f32
      %29 = vector.broadcast %cst_20 : f32 to vector<1x16xf32>
      %30 = arith.mulf %29, %28 : vector<1x16xf32>
      %31 = vector.broadcast %30 : vector<1x16xf32> to vector<128x16xf32>
      %32 = arith.addf %26, %31 : vector<128x16xf32>
      %cst_21 = arith.constant 0.150755674 : f32
      %33 = vector.broadcast %cst_21 : f32 to vector<128x16xf32>
      %34 = arith.mulf %33, %32 : vector<128x16xf32>
      %c0_22 = arith.constant 0 : index
      %c0_23 = arith.constant 0 : index
      %c0_24 = arith.constant 0 : index
      %35 = vector.load %arg9[%c0_22, %c0_23, %c0_24] : memref<2x128x16xf32, #tpu.memory_space<vmem>>, vector<1x128x16xf32>
      %36 = vector.shape_cast %35 : vector<1x128x16xf32> to vector<128x16xf32>
      %37 = vector.shape_cast %34 : vector<128x16xf32> to vector<1x128x16xf32>
      tpu.vector_store %arg9[%c0_22, %c0_23, %c0_24], %37 {strides = array<i32>} : memref<2x128x16xf32, #tpu.memory_space<vmem>>, vector<1x128x16xf32>,
      %c1 = arith.constant 1 : index
      %c0_25 = arith.constant 0 : index
      %c0_26 = arith.constant 0 : index
      %38 = vector.load %arg7[%c1, %c0_25, %c0_26] : memref<2x1x128xf32, #tpu.memory_space<vmem>>, vector<1x1x128xf32>
      %39 = vector.shape_cast %38 : vector<1x1x128xf32> to vector<1x128xf32>
      %cst_27 = arith.constant 8.000000e-04 : f32
      %40 = vector.broadcast %cst_27 : f32 to vector<1x128xf32>
      %41 = arith.addf %39, %40 : vector<1x128xf32>
      %cst_28 = arith.constant 0.150755674 : f32
      %42 = vector.broadcast %cst_28 : f32 to vector<1x128xf32>
      %43 = arith.mulf %42, %41 : vector<1x128xf32>
      %c1_29 = arith.constant 1 : index
      %c0_30 = arith.constant 0 : index
      %c0_31 = arith.constant 0 : index
      %44 = vector.load %arg7[%c1_29, %c0_30, %c0_31] : memref<2x1x128xf32, #tpu.memory_space<vmem>>, vector<1x1x128xf32>
      %45 = vector.shape_cast %44 : vector<1x1x128xf32> to vector<1x128xf32>
      %46 = vector.shape_cast %43 : vector<1x128xf32> to vector<1x1x128xf32>
      tpu.vector_store %arg7[%c1_29, %c0_30, %c0_31], %46 {strides = array<i32>} : memref<2x1x128xf32, #tpu.memory_space<vmem>>, vector<1x1x128xf32>,
      %c1_32 = arith.constant 1 : index
      %c0_33 = arith.constant 0 : index
      %c0_34 = arith.constant 0 : index
      %47 = vector.load %arg8[%c1_32, %c0_33, %c0_34] : memref<2x128x16xf32, #tpu.memory_space<vmem>>, vector<1x128x16xf32>
      %48 = vector.shape_cast %47 : vector<1x128x16xf32> to vector<128x16xf32>
      %c1_35 = arith.constant 1 : index
      %c0_36 = arith.constant 0 : index
      %c0_37 = arith.constant 0 : index
      %49 = vector.load %arg10[%c1_35, %c0_36, %c0_37] : memref<2x1x16xf32, #tpu.memory_space<vmem>>, vector<1x1x16xf32>
      %50 = vector.shape_cast %49 : vector<1x1x16xf32> to vector<1x16xf32>
      %cst_38 = arith.constant 9.99999974E-5 : f32
      %51 = vector.broadcast %cst_38 : f32 to vector<1x16xf32>
      %52 = arith.mulf %51, %50 : vector<1x16xf32>
      %53 = vector.broadcast %52 : vector<1x16xf32> to vector<128x16xf32>
      %54 = arith.addf %48, %53 : vector<128x16xf32>
      %cst_39 = arith.constant 0.150755674 : f32
      %55 = vector.broadcast %cst_39 : f32 to vector<128x16xf32>
      %56 = arith.mulf %55, %54 : vector<128x16xf32>
      %c1_40 = arith.constant 1 : index
      %c0_41 = arith.constant 0 : index
      %c0_42 = arith.constant 0 : index
      %57 = vector.load %arg9[%c1_40, %c0_41, %c0_42] : memref<2x128x16xf32, #tpu.memory_space<vmem>>, vector<1x128x16xf32>
      %58 = vector.shape_cast %57 : vector<1x128x16xf32> to vector<128x16xf32>
      %59 = vector.shape_cast %56 : vector<128x16xf32> to vector<1x128x16xf32>
      tpu.vector_store %arg9[%c1_40, %c0_41, %c0_42], %59 {strides = array<i32>} : memref<2x128x16xf32, #tpu.memory_space<vmem>>, vector<1x128x16xf32>,
    } else {
    }
    %c1_i32_5 = arith.constant 1 : i32
    %13 = arith.cmpi sge, %arg1, %c1_i32_5 : i32
    %14 = arith.extui %13 : i1 to i32
    %c0_i32_6 = arith.constant 0 : i32
    %15 = arith.cmpi ne, %14, %c0_i32_6 : i32
    scf.if %15 {
      %c0_7 = arith.constant 0 : index
      %c0_8 = arith.constant 0 : index
      %c0_9 = arith.constant 0 : index
      %16 = vector.load %arg2[%c0_7, %c0_8, %c0_9] : memref<1x8x32xf32, #tpu.memory_space<vmem>>, vector<1x8x16xf32>
      %17 = vector.shape_cast %16 : vector<1x8x16xf32> to vector<8x16xf32>
      %cst = arith.constant dense<0.000000e+00> : vector<8x128xf32>
      %18 = tpu.matmul %17, %0, %cst {dimension_numbers = #tpu.dot_dimension_numbers<[1], [1], [0], [0], [0, 0, 1, 0], [], []>} : vector<8x16xf32>, vector<128x16xf32>, vector<8x128xf32> -> vector<8x128xf32>
      %19 = arith.mulf %17, %17 : vector<8x16xf32>
      %cst_10 = arith.constant dense<0.000000e+00> : vector<8xf32>
      %20 = vector.multi_reduction <add>, %19, %cst_10 [1] : vector<8x16xf32> to vector<8xf32>
      %21 = vector.shape_cast %20 : vector<8xf32> to vector<8x1xf32>
      %cst_11 = arith.constant 1.250000e-01 : f32
      %22 = vector.broadcast %cst_11 : f32 to vector<8x1xf32>
      %23 = arith.mulf %22, %21 : vector<8x1xf32>
      %cst_12 = arith.constant -1.000000e+30 : f32
      %24 = vector.shape_cast %3 : vector<1x128xi1> to vector<1x128xi1>
      %25 = vector.broadcast %24 : vector<1x128xi1> to vector<8x128xi1>
      %26 = vector.broadcast %cst_12 : f32 to vector<8x128xf32>
      %27 = arith.select %25, %18, %26 : vector<8x128xi1>, vector<8x128xf32>
      %cst_13 = arith.constant dense<0xFF800000> : vector<8xf32>
      %28 = vector.multi_reduction <maximumf>, %27, %cst_13 [1] : vector<8x128xf32> to vector<8xf32>
      %29 = vector.shape_cast %28 : vector<8xf32> to vector<8x1xf32>
      %30 = vector.broadcast %23 : vector<8x1xf32> to vector<8x128xf32>
      %31 = arith.subf %18, %30 : vector<8x128xf32>
      %32 = vector.broadcast %29 : vector<8x1xf32> to vector<8x128xf32>
      %33 = arith.subf %31, %32 : vector<8x128xf32>
      %cst_14 = arith.constant -1.89209485 : f32
      %34 = vector.broadcast %cst_14 : f32 to vector<8x128xf32>
      %35 = arith.addf %33, %34 : vector<8x128xf32>
      %36 = math.exp %35 : vector<8x128xf32>
      %cst_15 = arith.constant 1.50755668E-5 : f32
      %37 = vector.broadcast %cst_15 : f32 to vector<8x128xf32>
      %38 = arith.addf %36, %37 : vector<8x128xf32>
      %cst_16 = arith.constant 0.000000e+00 : f32
      %39 = vector.shape_cast %3 : vector<1x128xi1> to vector<1x128xi1>
      %40 = vector.broadcast %39 : vector<1x128xi1> to vector<8x128xi1>
      %41 = vector.broadcast %cst_16 : f32 to vector<8x128xf32>
      %42 = arith.select %40, %38, %41 : vector<8x128xi1>, vector<8x128xf32>
      %c0_17 = arith.constant 0 : index
      %c0_18 = arith.constant 0 : index
      %c0_19 = arith.constant 0 : index
      %43 = vector.load %arg7[%c0_17, %c0_18, %c0_19] : memref<2x1x128xf32, #tpu.memory_space<vmem>>, vector<1x1x128xf32>
      %44 = vector.shape_cast %43 : vector<1x1x128xf32> to vector<1x128xf32>
      %45 = vector.broadcast %44 : vector<1x128xf32> to vector<8x128xf32>
      %46 = arith.mulf %42, %45 : vector<8x128xf32>
      %cst_20 = arith.constant dense<0.000000e+00> : vector<8xf32>
      %47 = vector.multi_reduction <add>, %46, %cst_20 [1] : vector<8x128xf32> to vector<8xf32>
      %48 = vector.shape_cast %47 : vector<8xf32> to vector<8x1xf32>
      %cst_21 = arith.constant 9.99999997E-7 : f32
      %49 = vector.broadcast %cst_21 : f32 to vector<8x1xf32>
      %50 = arith.addf %48, %49 : vector<8x1xf32>
      %51 = tpu.reciprocal %50 {approx = true} : vector<8x1xf32> -> vector<8x1xf32>
      %52 = arith.mulf %50, %51 : vector<8x1xf32>
      %cst_22 = arith.constant 2.000000e+00 : f32
      %53 = vector.broadcast %cst_22 : f32 to vector<8x1xf32>
      %54 = arith.subf %53, %52 : vector<8x1xf32>
      %55 = arith.mulf %51, %54 : vector<8x1xf32>
      %c0_23 = arith.constant 0 : index
      %c0_24 = arith.constant 0 : index
      %c0_25 = arith.constant 0 : index
      %56 = vector.load %arg9[%c0_23, %c0_24, %c0_25] : memref<2x128x16xf32, #tpu.memory_space<vmem>>, vector<1x128x16xf32>
      %57 = vector.shape_cast %56 : vector<1x128x16xf32> to vector<128x16xf32>
      %cst_26 = arith.constant dense<0.000000e+00> : vector<8x16xf32>
      %58 = tpu.matmul %42, %57, %cst_26 {dimension_numbers = #tpu.dot_dimension_numbers<[1], [0], [0], [1], [0, 0, 1, 1], [], []>} : vector<8x128xf32>, vector<128x16xf32>, vector<8x16xf32> -> vector<8x16xf32>
      %59 = vector.broadcast %55 : vector<8x1xf32> to vector<8x16xf32>
      %60 = arith.mulf %58, %59 : vector<8x16xf32>
      %c0_27 = arith.constant 0 : index
      %c0_28 = arith.constant 0 : index
      %c0_29 = arith.constant 0 : index
      %61 = vector.load %arg6[%c0_27, %c0_28, %c0_29] : memref<1x8x32xf32, #tpu.memory_space<vmem>>, vector<1x8x16xf32>
      %62 = vector.shape_cast %61 : vector<1x8x16xf32> to vector<8x16xf32>
      %63 = vector.shape_cast %60 : vector<8x16xf32> to vector<1x8x16xf32>
      tpu.vector_store %arg6[%c0_27, %c0_28, %c0_29], %63 {strides = array<i32>} : memref<1x8x32xf32, #tpu.memory_space<vmem>>, vector<1x8x16xf32>,
      %c0_30 = arith.constant 0 : index
      %c0_31 = arith.constant 0 : index
      %c16 = arith.constant 16 : index
      %64 = vector.load %arg2[%c0_30, %c0_31, %c16] : memref<1x8x32xf32, #tpu.memory_space<vmem>>, vector<1x8x16xf32>
      %65 = vector.shape_cast %64 : vector<1x8x16xf32> to vector<8x16xf32>
      %cst_32 = arith.constant dense<0.000000e+00> : vector<8x128xf32>
      %66 = tpu.matmul %65, %0, %cst_32 {dimension_numbers = #tpu.dot_dimension_numbers<[1], [1], [0], [0], [0, 0, 1, 0], [], []>} : vector<8x16xf32>, vector<128x16xf32>, vector<8x128xf32> -> vector<8x128xf32>
      %67 = arith.mulf %65, %65 : vector<8x16xf32>
      %cst_33 = arith.constant dense<0.000000e+00> : vector<8xf32>
      %68 = vector.multi_reduction <add>, %67, %cst_33 [1] : vector<8x16xf32> to vector<8xf32>
      %69 = vector.shape_cast %68 : vector<8xf32> to vector<8x1xf32>
      %cst_34 = arith.constant 1.250000e-01 : f32
      %70 = vector.broadcast %cst_34 : f32 to vector<8x1xf32>
      %71 = arith.mulf %70, %69 : vector<8x1xf32>
      %cst_35 = arith.constant -1.000000e+30 : f32
      %72 = vector.shape_cast %3 : vector<1x128xi1> to vector<1x128xi1>
      %73 = vector.broadcast %72 : vector<1x128xi1> to vector<8x128xi1>
      %74 = vector.broadcast %cst_35 : f32 to vector<8x128xf32>
      %75 = arith.select %73, %66, %74 : vector<8x128xi1>, vector<8x128xf32>
      %cst_36 = arith.constant dense<0xFF800000> : vector<8xf32>
      %76 = vector.multi_reduction <maximumf>, %75, %cst_36 [1] : vector<8x128xf32> to vector<8xf32>
      %77 = vector.shape_cast %76 : vector<8xf32> to vector<8x1xf32>
      %78 = vector.broadcast %71 : vector<8x1xf32> to vector<8x128xf32>
      %79 = arith.subf %66, %78 : vector<8x128xf32>
      %80 = vector.broadcast %77 : vector<8x1xf32> to vector<8x128xf32>
      %81 = arith.subf %79, %80 : vector<8x128xf32>
      %cst_37 = arith.constant -1.89209485 : f32
      %82 = vector.broadcast %cst_37 : f32 to vector<8x128xf32>
      %83 = arith.addf %81, %82 : vector<8x128xf32>
      %84 = math.exp %83 : vector<8x128xf32>
      %cst_38 = arith.constant 1.50755668E-5 : f32
      %85 = vector.broadcast %cst_38 : f32 to vector<8x128xf32>
      %86 = arith.addf %84, %85 : vector<8x128xf32>
      %cst_39 = arith.constant 0.000000e+00 : f32
      %87 = vector.shape_cast %3 : vector<1x128xi1> to vector<1x128xi1>
      %88 = vector.broadcast %87 : vector<1x128xi1> to vector<8x128xi1>
      %89 = vector.broadcast %cst_39 : f32 to vector<8x128xf32>
      %90 = arith.select %88, %86, %89 : vector<8x128xi1>, vector<8x128xf32>
      %c1 = arith.constant 1 : index
      %c0_40 = arith.constant 0 : index
      %c0_41 = arith.constant 0 : index
      %91 = vector.load %arg7[%c1, %c0_40, %c0_41] : memref<2x1x128xf32, #tpu.memory_space<vmem>>, vector<1x1x128xf32>
      %92 = vector.shape_cast %91 : vector<1x1x128xf32> to vector<1x128xf32>
      %93 = vector.broadcast %92 : vector<1x128xf32> to vector<8x128xf32>
      %94 = arith.mulf %90, %93 : vector<8x128xf32>
      %cst_42 = arith.constant dense<0.000000e+00> : vector<8xf32>
      %95 = vector.multi_reduction <add>, %94, %cst_42 [1] : vector<8x128xf32> to vector<8xf32>
      %96 = vector.shape_cast %95 : vector<8xf32> to vector<8x1xf32>
      %cst_43 = arith.constant 9.99999997E-7 : f32
      %97 = vector.broadcast %cst_43 : f32 to vector<8x1xf32>
      %98 = arith.addf %96, %97 : vector<8x1xf32>
      %99 = tpu.reciprocal %98 {approx = true} : vector<8x1xf32> -> vector<8x1xf32>
      %100 = arith.mulf %98, %99 : vector<8x1xf32>
      %cst_44 = arith.constant 2.000000e+00 : f32
      %101 = vector.broadcast %cst_44 : f32 to vector<8x1xf32>
      %102 = arith.subf %101, %100 : vector<8x1xf32>
      %103 = arith.mulf %99, %102 : vector<8x1xf32>
      %c1_45 = arith.constant 1 : index
      %c0_46 = arith.constant 0 : index
      %c0_47 = arith.constant 0 : index
      %104 = vector.load %arg9[%c1_45, %c0_46, %c0_47] : memref<2x128x16xf32, #tpu.memory_space<vmem>>, vector<1x128x16xf32>
      %105 = vector.shape_cast %104 : vector<1x128x16xf32> to vector<128x16xf32>
      %cst_48 = arith.constant dense<0.000000e+00> : vector<8x16xf32>
      %106 = tpu.matmul %90, %105, %cst_48 {dimension_numbers = #tpu.dot_dimension_numbers<[1], [0], [0], [1], [0, 0, 1, 1], [], []>} : vector<8x128xf32>, vector<128x16xf32>, vector<8x16xf32> -> vector<8x16xf32>
      %107 = vector.broadcast %103 : vector<8x1xf32> to vector<8x16xf32>
      %108 = arith.mulf %106, %107 : vector<8x16xf32>
      %c0_49 = arith.constant 0 : index
      %c0_50 = arith.constant 0 : index
      %c16_51 = arith.constant 16 : index
      %109 = vector.load %arg6[%c0_49, %c0_50, %c16_51] : memref<1x8x32xf32, #tpu.memory_space<vmem>>, vector<1x8x16xf32>
      %110 = vector.shape_cast %109 : vector<1x8x16xf32> to vector<8x16xf32>
      %111 = vector.shape_cast %108 : vector<8x16xf32> to vector<1x8x16xf32>
      tpu.vector_store %arg6[%c0_49, %c0_50, %c16_51], %111 {strides = array<i32>} : memref<1x8x32xf32, #tpu.memory_space<vmem>>, vector<1x8x16xf32>,
    } else {
    }
    return
  }
  func.func @transform_0(%arg0: i32, %arg1: i32) -> (i32, i32, i32) {
    %c1_i32 = arith.constant 1 : i32
    %0 = arith.subi %arg1, %c1_i32 : i32
    %c0_i32 = arith.constant 0 : i32
    %1 = arith.maxsi %0, %c0_i32 : i32
    %c0_i32_0 = arith.constant 0 : i32
    %c0_i32_1 = arith.constant 0 : i32
    return %arg0, %1, %c0_i32_0 : i32, i32, i32
  }
  func.func @transform_1(%arg0: i32, %arg1: i32) -> (i32, i32, i32) {
    %c0_i32 = arith.constant 0 : i32
    %0 = arith.minsi %arg1, %c0_i32 : i32
    %c0_i32_0 = arith.constant 0 : i32
    %c0_i32_1 = arith.constant 0 : i32
    return %arg0, %0, %c0_i32_0 : i32, i32, i32
  }
  func.func @transform_2(%arg0: i32, %arg1: i32) -> (i32, i32, i32) {
    %c0_i32 = arith.constant 0 : i32
    %0 = arith.minsi %arg1, %c0_i32 : i32
    %c0_i32_0 = arith.constant 0 : i32
    %c0_i32_1 = arith.constant 0 : i32
    return %arg0, %0, %c0_i32_0 : i32, i32, i32
  }
  func.func @transform_3(%arg0: i32, %arg1: i32) -> (i32, i32) {
    %c0_i32 = arith.constant 0 : i32
    %c0_i32_0 = arith.constant 0 : i32
    %c0_i32_1 = arith.constant 0 : i32
    return %c0_i32, %c0_i32_0 : i32, i32
  }
  func.func @transform_4(%arg0: i32, %arg1: i32) -> (i32, i32, i32) {
    %c1_i32 = arith.constant 1 : i32
    %0 = arith.subi %arg1, %c1_i32 : i32
    %c0_i32 = arith.constant 0 : i32
    %1 = arith.maxsi %0, %c0_i32 : i32
    %c0_i32_0 = arith.constant 0 : i32
    %c0_i32_1 = arith.constant 0 : i32
    return %arg0, %1, %c0_i32_0 : i32, i32, i32
  }
}

</mosaic_0001>

<bundles_post_ra>
// kernel: tpu_custom_call.1
= control target key start
LH: loop header
LB: loop body
LE: loop exit
PB: predicated region body
PF: predicated region fallthrough
CT: control target
= control target key end

     0   :  { %s3803_s0 = inlined_call_operand.vmem [shape: f32[2,8,32], index: 0, kind: input, shape index: {}]   ;;  %s3804_s1 = inlined_call_operand.vmem [shape: f32[2,8,32], index: 1, kind: input, shape index: {}]   ;;  %s3805_s2 = inlined_call_operand.vmem [shape: f32[2,8,32], index: 2, kind: input, shape index: {}]   ;;  %s3806_s3 = inlined_call_operand.vmem [shape: f32[128,16], index: 3, kind: input, shape index: {}]   ;;  %s3807_s4 = inlined_call_operand.hbm [shape: f32[2,8,32], index: 4, kind: output, shape index: {}]  }
   0x1   :  { %3817 = sst [smem:[#allocation17_spill]] %s3806_s3 }
   0x2   :  { %9 = vsyncpa [#allocation8], 0 }
   0x3   :  { %11 = vsyncpa [#allocation8 + $0x1], 0  ;;  %s3048_s15 = smov 0   ;;  %s3050_s16 = smov 0  }
   0x4   :  { %s3052_s17 = smov 0   ;;  %s3054_s18 = smov 0  }
   0x5   :  { %s3056_s19 = smov 0   ;;  %s3058_s20 = smov 0  }
   0x6   :  { %s3060_s21 = smov 0   ;;  %s3062_s22 = smov 0  }
   0x7 LB: > { %s2093_s23 = sadd.s32 4294967295, %s3007_s22   ;;  %s2094_s24 = sadd.s32 4294967294, %s3007_s22   ;;  %s3007_s22 = sphi %s3062_s22, %s17_s22   ;;  %s3003_s21 = sphi %s3060_s21, %s3847_s21   ;;  %s2999_s20 = sphi %s3058_s20, %s3846_s20   ;;  %s2995_s19 = sphi %s3056_s19, %s3845_s19   ;;  %s2991_s18 = sphi %s3054_s18, %s3844_s18   ;;  %s2987_s17 = sphi %s3052_s17, %s3843_s17   ;;  %s2983_s16 = sphi %s3050_s16, %s3842_s16   ;;  %s2979_s15 = sphi %s3048_s15, %s3841_s15  }
   0x8   : > { %s26_s25 = sadd.s32 1, %s2999_s20  ;;  %s29_s26 = sadd.s32 1, %s3003_s21 }
   0x9   : > { %p27_p0 = scmp.ge.s32.totalorder %s26_s25, 2  ;;  %s163_s27 = sadd.s32 1, %s2987_s17 }
   0xa   : > { %p173_p2 = scmp.ne.s32.totalorder %s2987_s17, %s2983_s16  ;;  %p174_p3 = scmp.eq.s32.totalorder %s2093_s23, 3 }
   0xb   : > { %s3849_s25 = smov (%p27_p0, %s26_s25), 0  ;;  %s3851_s26 = smov (!%p27_p0, %s29_s26), %s3003_s21 }
   0xc   : > { %3818 = sst [smem:[#allocation10_spill]] %s3849_s25  ;;  %p31_p1 = scmp.ge.s32.totalorder %s3851_s26, 2 }
   0xd   : > { %p179_p4 = scmp.ne.s32.totalorder %s2983_s16, %s2979_s15  ;;  %p3104_p5 = por %p174_p3, %p173_p2 }
   0xe   : > { %s3853_s26 = smov (%p31_p1, %s3851_s26), 0  ;;  %p180_p7 = scmp.eq.s32.totalorder %s2094_s24, 3 }
   0xf   : > { %3819 = sst [smem:[#allocation11_spill]] %s3853_s26  ;;  %s158_s28 = ssub.s32 %s3003_s21, %s3853_s26 }
  0x10   : > { %p161_p6 = scmp.eq.s32.totalorder %s158_s28, 0  ;;  %p2101_p8 = scmp.ge.s32.totalorder %s3007_s22, 1 }
  0x11   : > { %p245_p9 = scmp.lt.s32.totalorder %s3007_s22, 5  ;;  %p3113_p10 = por %p180_p7, %p179_p4 }
  0x12   : > { %s3111_s30 = scalar_select %p161_p6, %s2987_s17, %s163_s27  }
  0x13   : > { %p246_p11 = pnand %p2101_p8, %p245_p9 }
  0x15   : > { %249 = sbr.rel (%p246_p11) target bundleno = 3125 (0xc35), region = 36 }
  0x1c   : > { %s3808_s6 = sand.u32 1, %s2983_s16   ;;  %p297_p12 = scmp.lt.s32.totalorder %s2995_s19, 1  ;;  %v3810_v3 = vlaneseq }
  0x1d   : > { %s3822_s3 = sld [smem:[#allocation17_spill]]  ;;  %s2102_s13 = sshll.u32 %s3808_s6, 3 }
  0x1e   : > { %p307_p13 = scmp.lt.s32.totalorder %s2991_s18, 0  ;;  %v3168_v10 = vand.u32 127, %v3810_v3  ;;  %p2118_p0 = scmp.ne.s32.totalorder %s2991_s18, 0 }
  0x1f   : > { %s298_s23 = scalar_select %p297_p12, %s2995_s19, 1 }
  0x20   : > { %3823 = vst [vmem:[#allocation12_spill] sm:$0xff] %v3168_v10  ;;  %s308_s10 = scalar_select %p307_p13, %s2991_s18, 0  ;;  %vm350_vm0 = vcmp.lt.s32.totalorder %v3168_v10, 44 }
  0x21   : > { %s2109_s7 = sshll.u32 %s298_s23, 3  ;;  %vm357_vm1 = vcmask (!%p2118_p0), 130048   ;;  %vm390_vm2 = vcmask (!%p2118_p0), 122880   ;;  %vm393_vm3 = vcmask (!%p2118_p0), 0   ;;  %v3009_v18 = vmov (!%p2118_p0), 0.0  }
  0x22   : > { %s3215_s6 = scalar_lea.vmem %s3803_s0, %s2109_s7  ;;  %s3855_s10 = smov (!%p307_p13, %s308_s10), 0  ;;  %355 = vst [vmem:[#allocation2] sm:$0x1] (!%p2118_p0), %v3009_v18  ;;  %356 = vst [vmem:[#allocation2 + $0x1] sm:$0x1] (!%p2118_p0), %v3009_v18 }
  0x23   : > { %v3122_v0 = vld [vmem:[%s3822_s3] sm:$0xff]  ;;  %v3127_v1 = vld [vmem:[%s3822_s3 + $0x8] sm:$0xff]  ;;  %v3132_v2 = vld [vmem:[%s3822_s3 + $0x10] sm:$0xff]  ;;  %s313_s14 = sadd.s32 %s3855_s10, %s298_s23  ;;  %354 = sbr.rel (%p2118_p0) target bundleno = 58 (0x3a), region = 40  ;;  %358 = vst.msk [vmem:[#allocation3] sm:$0xff] (!%p2118_p0), %vm357_vm1, %v3009_v18 }
  0x24   : > { %v3140_v4 = vld [vmem:[%s3822_s3 + $0x18] sm:$0xff]  ;;  %v3145_v5 = vld [vmem:[%s3822_s3 + $0x20] sm:$0xff]  ;;  %v3150_v6 = vld [vmem:[%s3822_s3 + $0x28] sm:$0xff]  ;;  %s3219_s24 = sshll.u32 %s313_s14, 3  ;;  %359 = vst.msk [vmem:[#allocation3 + $0x8] sm:$0xff] (!%p2118_p0), %vm357_vm1, %v3009_v18 }
  0x25   : > { %v3155_v7 = vld [vmem:[%s3822_s3 + $0x30] sm:$0xff]  ;;  %v3160_v8 = vld [vmem:[%s3822_s3 + $0x38] sm:$0xff]  ;;  %v3165_v9 = vld [vmem:[%s3822_s3 + $0x40] sm:$0xff]  ;;  %s315_s26 = scalar_lea.vmem %s3804_s1, %s3219_s24  ;;  %s326_s9 = scalar_lea.vmem %s3805_s2, %s3219_s24  ;;  %360 = vst.msk [vmem:[#allocation3 + $0x10] sm:$0xff] (!%p2118_p0), %vm357_vm1, %v3009_v18  ;;  %v3010_v19 = vmov (!%p2118_p0), -1e+30  }
  0x26   : > { %v3176_v11 = vld [vmem:[%s3822_s3 + $0x48] sm:$0xff]  ;;  %v3181_v12 = vld [vmem:[%s3822_s3 + $0x50] sm:$0xff]  ;;  %v3186_v13 = vld [vmem:[%s3822_s3 + $0x58] sm:$0xff]  ;;  %361 = vst.msk [vmem:[#allocation3 + $0x18] sm:$0xff] (!%p2118_p0), %vm357_vm1, %v3009_v18 }
  0x27   : > { %v3194_v14 = vld [vmem:[%s3822_s3 + $0x60] sm:$0xff]  ;;  %v3199_v15 = vld [vmem:[%s3822_s3 + $0x68] sm:$0xff]  ;;  %v3204_v16 = vld [vmem:[%s3822_s3 + $0x70] sm:$0xff]  ;;  %362 = vst.msk [vmem:[#allocation3 + $0x20] sm:$0xff] (!%p2118_p0), %vm357_vm1, %v3009_v18 }
  0x28   : > { %3824 = vst [vmem:[#allocation13_spill] sm:$0xff] %v3194_v14  ;;  %3825 = vst [vmem:[#allocation14_spill] sm:$0xff] %v3199_v15  ;;  %v3210_v17 = vld [vmem:[%s3822_s3 + $0x78] sm:$0xff]  ;;  %s3229_s3 = scalar_lea.vmem [#allocation7], %s2102_s13 }
  0x29   : > { %3826 = vst [vmem:[#allocation15_spill] sm:$0xff] %v3204_v16  ;;  %3827 = vst [vmem:[#allocation16_spill] sm:$0xff] %v3210_v17 }
  0x2a   : > { %363 = vst.msk [vmem:[#allocation3 + $0x28] sm:$0xff] %vm357_vm1, %v3009_v18  ;;  %364 = vst.msk [vmem:[#allocation3 + $0x30] sm:$0xff] %vm357_vm1, %v3009_v18 }
  0x2b   : > { %365 = vst.msk [vmem:[#allocation3 + $0x38] sm:$0xff] %vm357_vm1, %v3009_v18  ;;  %366 = vst.msk [vmem:[#allocation3 + $0x40] sm:$0xff] %vm357_vm1, %v3009_v18 }
  0x2c   : > { %367 = vst.msk [vmem:[#allocation3 + $0x48] sm:$0xff] %vm357_vm1, %v3009_v18  ;;  %368 = vst.msk [vmem:[#allocation3 + $0x50] sm:$0xff] %vm357_vm1, %v3009_v18 }
  0x2d   : > { %369 = vst.msk [vmem:[#allocation3 + $0x58] sm:$0xff] %vm357_vm1, %v3009_v18  ;;  %370 = vst.msk [vmem:[#allocation3 + $0x60] sm:$0xff] %vm357_vm1, %v3009_v18 }
  0x2e   : > { %371 = vst.msk [vmem:[#allocation3 + $0x68] sm:$0xff] %vm357_vm1, %v3009_v18  ;;  %372 = vst.msk [vmem:[#allocation3 + $0x70] sm:$0xff] %vm357_vm1, %v3009_v18 }
  0x2f   : > { %373 = vst.msk [vmem:[#allocation3 + $0x78] sm:$0xff] %vm357_vm1, %v3009_v18  ;;  %374 = vst.msk [vmem:[#allocation3 + $0x80] sm:$0xff] %vm357_vm1, %v3009_v18 }
  0x30   : > { %375 = vst.msk [vmem:[#allocation3 + $0x88] sm:$0xff] %vm357_vm1, %v3009_v18  ;;  %376 = vst.msk [vmem:[#allocation3 + $0x90] sm:$0xff] %vm357_vm1, %v3009_v18 }
  0x31   : > { %377 = vst.msk [vmem:[#allocation3 + $0x98] sm:$0xff] %vm357_vm1, %v3009_v18  ;;  %378 = vst.msk [vmem:[#allocation3 + $0xa0] sm:$0xff] %vm357_vm1, %v3009_v18 }
  0x32   : > { %379 = vst.msk [vmem:[#allocation3 + $0xa8] sm:$0xff] %vm357_vm1, %v3009_v18  ;;  %380 = vst.msk [vmem:[#allocation3 + $0xb0] sm:$0xff] %vm357_vm1, %v3009_v18 }
  0x33   : > { %381 = vst.msk [vmem:[#allocation3 + $0xb8] sm:$0xff] %vm357_vm1, %v3009_v18  ;;  %382 = vst.msk [vmem:[#allocation3 + $0xc0] sm:$0xff] %vm357_vm1, %v3009_v18 }
  0x34   : > { %383 = vst.msk [vmem:[#allocation3 + $0xc8] sm:$0xff] %vm357_vm1, %v3009_v18  ;;  %384 = vst.msk [vmem:[#allocation3 + $0xd0] sm:$0xff] %vm357_vm1, %v3009_v18 }
  0x35   : > { %385 = vst.msk [vmem:[#allocation3 + $0xd8] sm:$0xff] %vm357_vm1, %v3009_v18  ;;  %386 = vst.msk [vmem:[#allocation3 + $0xe0] sm:$0xff] %vm357_vm1, %v3009_v18 }
  0x36   : > { %387 = vst.msk [vmem:[#allocation3 + $0xe8] sm:$0xff] %vm357_vm1, %v3009_v18  ;;  %388 = vst.msk [vmem:[#allocation3 + $0xf0] sm:$0xff] %vm357_vm1, %v3009_v18 }
  0x37   : > { %389 = vst.msk [vmem:[#allocation3 + $0xf8] sm:$0xff] %vm357_vm1, %v3009_v18 }
  0x38   : > { %391 = vst.msk [vmem:[#allocation5] sm:$0x1] %vm390_vm2, %v3009_v18  ;;  %392 = vst.msk [vmem:[#allocation5 + $0x1] sm:$0x1] %vm390_vm2, %v3009_v18 }
  0x39   : > { %394 = vst.msk [vmem:[#allocation6] sm:$0x1] %vm393_vm3, %v3010_v19  ;;  %395 = vst.msk [vmem:[#allocation6 + $0x1] sm:$0x1] %vm393_vm3, %v3010_v19 }
  0x3a PF: > { %p2119_p1 = scmp.ge.s32.totalorder %s2991_s18, 1 }
  0x3b   : > { %vm402_vm4 = vcmask (!%p2119_p1), 130048   ;;  %v3273_v20 = vpack.c.bf16 (!%p2119_p1), %v3127_v1, %v3122_v0  ;;  %v3011_v21 = vmov (!%p2119_p1), 0.0|0.0   ;;  %vm3012_vm6 = vmmov (!%p2119_p1), 0   ;;  %v400_v31 = vld [vmem:[%s315_s26] sm:$0xff] (!%p2119_p1)  ;;  %s3015_s23 = smov (!%p2119_p1), 112  }
  0x3c   : > { %399 = sbr.rel (%p2119_p1) target bundleno = 1856 (0x740), region = 44  ;;  %2629 = vmatprep.subr.bf16.mxu0 (!%p2119_p1), %v3011_v21  ;;  %vm3278_vm5 = vmpackc.low (!%p2119_p1), %vm402_vm4, %vm402_vm4  ;;  %v3013_v23 = vmov (!%p2119_p1), 0.0   ;;  %v3290_v24 = vpack.c.bf16 (!%p2119_p1), %v3140_v4, %v3132_v2  ;;  %v3298_v25 = vpack.c.bf16 (!%p2119_p1), %v3150_v6, %v3145_v5  ;;  %v3306_v26 = vpack.c.bf16 (!%p2119_p1), %v3160_v8, %v3155_v7  ;;  %v3366_v52 = vld [vmem:[%s326_s9] sm:$0xff] (!%p2119_p1) }
  0x3d   : > { %2632 = vmatpush3.bf16.xpose.msk.msra.mxu0 (!%p2119_p1), %vm3278_vm5, %v3273_v20  ;;  %2399 = vmatprep.mubr.msk.f32.mxu0 (!%p2119_p1), %vm3012_vm6, %v3013_v23  ;;  %v3314_v27 = vpack.c.bf16 (!%p2119_p1), %v3176_v11, %v3165_v9  ;;  %v3322_v28 = vpack.c.bf16 (!%p2119_p1), %v3186_v13, %v3181_v12  ;;  %v3330_v29 = vpack.c.bf16 (!%p2119_p1), %v3199_v15, %v3194_v14  ;;  %v3014_v37 = vmov (!%p2119_p1), 0  }
  0x3e   : > { %2633 = vmatprep.subr.bf16.mxu0 (!%p2119_p1), %v3011_v21  ;;  %v3338_v30 = vpack.c.bf16 (!%p2119_p1), %v3210_v17, %v3204_v16  ;;  %v524_v32 = vmul.f32 (!%p2119_p1), %v400_v31, %v400_v31  ;;  %2895 = vset.pattern.permute.xlu1 (!%p2119_p1), %v3014_v37  ;;  %v3353_v45 = vshrl.u32 (!%p2119_p1), %v3810_v3, 7  ;;  %vm888_vm7 = vcmask (!%p2119_p1), 0  }
  0x3f   : > { %2896 = vset.pattern.permute.xlu0 (!%p2119_p1), %v3014_v37  ;;  %2402 = vmatprep.subr.mxu1 (!%p2119_p1), %v3366_v52  ;;  %vm651_vm8 = vcmask (!%p2119_p1), 64512   ;;  %vm1330_vm9 = vcmask (!%p2119_p1), 261248   ;;  %vm886_vm10 = vcmask (!%p2119_p1), 122880  }
  0x40   : > { %v525_v36 = vsel (!%p2119_p1), %vm402_vm4, %v524_v32, 0.0  ;;  %v532_v46 = vld [vmem:[#allocation6] sm:$0x1] (!%p2119_p1)  ;;  %v3356_v47 = vsub.s32 (!%p2119_p1), 0, %v3353_v45  ;;  %2403 = vmatpush3.msra.mxu1 (!%p2119_p1), %v3366_v52 }
  0x41   : > { %2661 = vmatprep.subr.bf16.mxu1 (!%p2119_p1), %v3011_v21 }
  0x45   : > { %2636 = vmatpush3.bf16.xpose.msk.msra.mxu0 %vm3278_vm5, %v3290_v24 }
  0x46   : > { %2637 = vmatprep.subr.bf16.mxu0 %v3011_v21 }
  0x4d   : > { %2640 = vmatpush3.bf16.xpose.msk.msra.mxu0 %vm3278_vm5, %v3298_v25 }
  0x4e   : > { %2641 = vmatprep.subr.bf16.mxu0 %v3011_v21 }
  0x55   : > { %2644 = vmatpush3.bf16.xpose.msk.msra.mxu0 %vm3278_vm5, %v3306_v26 }
  0x56   : > { %2645 = vmatprep.subr.bf16.mxu0 %v3011_v21 }
  0x5d   : > { %2648 = vmatpush3.bf16.xpose.msk.msra.mxu0 %vm3278_vm5, %v3314_v27 }
  0x5e   : > { %2649 = vmatprep.subr.bf16.mxu0 %v3011_v21 }
  0x65   : > { %2652 = vmatpush3.bf16.xpose.msk.msra.mxu0 %vm3278_vm5, %v3322_v28 }
  0x66   : > { %2653 = vmatprep.subr.bf16.mxu0 %v3011_v21 }
  0x6d   : > { %2656 = vmatpush3.bf16.xpose.msk.msra.mxu0 %vm3278_vm5, %v3330_v29 }
  0x6e   : > { %2657 = vmatprep.subr.bf16.mxu0 %v3011_v21 }
  0x75   : > { %2660 = vmatpush3.bf16.xpose.msk.msra.mxu0 %vm3278_vm5, %v3338_v30 }
  0x7c   : > { %2400 = vmatmul.mubr.msk.f32.vlgmr.msra.gmra.mrb[0].mxu0 %vm402_vm4, %v400_v31 }
 0x14f   : > { %v520_v33 = vpop.f32.mrb[0].mxu0 }
 0x150   : > { %v2401_v34 = vpop.f32.mrb[1].mxu0  ;;  %v531_v35 = vsel %vm350_vm0, %v520_v33, -1e+30 }
 0x151   : > { %533 = vmax.xlane.f32.xlu0 %v531_v35 }
 0x155   : > { %526 = vadd.xlane.f32.xlu0 %v525_v36 }
 0x16b   : > { %893 = vrot.lane.b32.xlu0 %v400_v31, %s3015_s23 }
 0x1de   : > { %v534_v38 = vpop.xlane.xlu0 %533 }
 0x1df   : > { %v535_v39 = vrot.slane %v534_v38, 4 }
 0x1e1   : > { %v536_v40 = vmax.f32 %v534_v38, %v535_v39 }
 0x1e2   : > { %v527_v53 = vpop.xlane.xlu0 %526 }
 0x1e3   : > { %v537_v41 = vrot.slane %v536_v40, 2  ;;  %v528_v54 = vmul.f32 0.125, %v527_v53 }
 0x1e5   : > { %v538_v42 = vmax.f32 %v536_v40, %v537_v41  ;;  %v547_v55 = vsub.f32 %v520_v33, %v528_v54 }
 0x1e7   : > { %v539_v43 = vrot.slane %v538_v42, 1 }
 0x1e9   : > { %v540_v44 = vmax.f32 %v538_v42, %v539_v43  ;;  %v560_v42 = vld [vmem:[#allocation2] sm:$0x1] }
 0x1eb   : > { %2807 = vpush %v540_v44 }
 0x21c   : > { %s2808_s26 = spop %2807 }
 0x21d   : > { %v542_v48 = vstv %s2808_s26 }
 0x21e   : > { %v543_v49 = vmax.f32 %v532_v46, %v542_v48 }
 0x220   : > { %v544_v50 = vsub.f32 %v532_v46, %v543_v49  ;;  %889 = vst.msk [vmem:[#allocation6] sm:$0x1] %vm888_vm7, %v543_v49  ;;  %v552_v51 = vrot.slane %v543_v49, %v3356_v47 }
 0x222   : > { %554 = vperm.xlu1 %2895, %v552_v51   ;;  %v545_v60 = vmul.f32 1.442695, %v544_v50 }
 0x2a1   : > { %v555_v56 = vpop.permute.xlu1 %554 }
 0x2a2   : > { %v557_v57 = vsub.f32 %v547_v55, %v555_v56 }
 0x2a4   : > { %v558_v58 = vmul.f32 1.442695, %v557_v57 }
 0x2a6   : > { %2897 = vpow2.f32 %v558_v58 }
 0x2a7   : > { %2899 = vpow2.f32 %v545_v60 }
 0x2b0   : > { %v2898_v59 = vpop.eup %2897 }
 0x2b1   : > { %619 = vxpose.xlu1.b32.start.end [1/1] (short) %v2898_v59, 128  ;;  %v3372_v61 = vpop.eup %2899  ;;  %v571_v38 = vrot.slane %v2898_v59, 4 }
 0x30b   : > { %969 = vrot.lane.b32.xlu1 %v524_v32, %s3015_s23 }
 0x30f   : > { %563 = vperm.xlu1 %2895, %v3372_v61  }
 0x331   : > { %v635_v62 = vpop.trf.xlu1 }
 0x332   : > { %2404 = vmatprep.mubr.msk.f32.mxu1 %vm651_vm8, %v635_v62 }
 0x335   : > { %v636_v63 = vpop.trf.xlu1 }
 0x336   : > { %2405 = vmatmul.mubr.msk.f32.vlgmr.msra.gmra.mrb[0].mxu1 %vm651_vm8, %v636_v63 }
 0x337   : > { %2664 = vmatpush3.bf16.xpose.msk.msra.mxu1 %vm3278_vm5, %v3273_v20 }
 0x338   : > { %2665 = vmatprep.subr.bf16.mxu1 %v3011_v21 }
 0x339   : > { %v637_v18 = vpop.trf.xlu1 }
 0x33a   : > { %2407 = vmatprep.mubr.msk.f32.mxu1 %vm651_vm8, %v637_v18 }
 0x33d   : > { %v638_v19 = vpop.trf.xlu1 }
 0x33e   : > { %2408 = vmatmul.mubr.msk.f32.gmra.mrb[2].mxu1 %vm651_vm8, %v638_v19 }
 0x33f   : > { %2668 = vmatpush3.bf16.xpose.msk.msra.mxu1 %vm3278_vm5, %v3290_v24 }
 0x340   : > { %2669 = vmatprep.subr.bf16.mxu1 %v3011_v21 }
 0x341   : > { %v639_v31 = vpop.trf.xlu1 }
 0x342   : > { %2410 = vmatprep.mubr.msk.f32.mxu1 %vm651_vm8, %v639_v31 }
 0x345   : > { %v640_v32 = vpop.trf.xlu1 }
 0x346   : > { %2411 = vmatmul.mubr.msk.f32.gmra.mrb[4].mxu1 %vm651_vm8, %v640_v32 }
 0x347   : > { %2672 = vmatpush3.bf16.xpose.msk.msra.mxu1 %vm3278_vm5, %v3298_v25 }
 0x348   : > { %2673 = vmatprep.subr.bf16.mxu1 %v3011_v21 }
 0x349   : > { %v641_v20 = vpop.trf.xlu1 }
 0x34a   : > { %2413 = vmatprep.mubr.msk.f32.mxu1 %vm651_vm8, %v641_v20 }
 0x34d   : > { %v642_v33 = vpop.trf.xlu1 }
 0x34e   : > { %2414 = vmatmul.mubr.msk.f32.gmra.mrb[6].mxu1 %vm651_vm8, %v642_v33 }
 0x34f   : > { %2676 = vmatpush3.bf16.xpose.msk.msra.mxu1 %vm3278_vm5, %v3306_v26 }
 0x350   : > { %2677 = vmatprep.subr.bf16.mxu1 %v3011_v21 }
 0x351   : > { %v643_v24 = vpop.trf.xlu1 }
 0x352   : > { %2416 = vmatprep.mubr.msk.f32.mxu1 %vm651_vm8, %v643_v24 }
 0x355   : > { %v644_v34 = vpop.trf.xlu1 }
 0x356   : > { %2417 = vmatmul.mubr.msk.f32.gmra.mrb[8].mxu1 %vm651_vm8, %v644_v34 }
 0x357   : > { %2680 = vmatpush3.bf16.xpose.msk.msra.mxu1 %vm3278_vm5, %v3314_v27 }
 0x358   : > { %2681 = vmatprep.subr.bf16.mxu1 %v3011_v21 }
 0x359   : > { %v645_v25 = vpop.trf.xlu1 }
 0x35a   : > { %2419 = vmatprep.mubr.msk.f32.mxu1 %vm651_vm8, %v645_v25 }
 0x35d   : > { %v646_v35 = vpop.trf.xlu1 }
 0x35e   : > { %2420 = vmatmul.mubr.msk.f32.gmra.mrb[10].mxu1 %vm651_vm8, %v646_v35 }
 0x35f   : > { %2684 = vmatpush3.bf16.xpose.msk.msra.mxu1 %vm3278_vm5, %v3322_v28  ;;  %v894_v28 = vpop.permute.xlu0 %893 }
 0x360   : > { %2685 = vmatprep.subr.bf16.mxu1 %v3011_v21 }
 0x361   : > { %v647_v26 = vpop.trf.xlu1 }
 0x362   : > { %2422 = vmatprep.mubr.msk.f32.mxu1 %vm651_vm8, %v647_v26 }
 0x365   : > { %v648_v36 = vpop.trf.xlu1 }
 0x366   : > { %2423 = vmatmul.mubr.msk.f32.gmra.mrb[12].mxu1 %vm651_vm8, %v648_v36 }
 0x367   : > { %2688 = vmatpush3.bf16.xpose.msk.msra.mxu1 %vm3278_vm5, %v3330_v29  ;;  %v572_v29 = vadd.f32 %v2898_v59, %v571_v38 }
 0x368   : > { %2689 = vmatprep.subr.bf16.mxu1 %v3011_v21 }
 0x369   : > { %v649_v27 = vpop.trf.xlu1  ;;  %v573_v39 = vrot.slane %v572_v29, 2 }
 0x36a   : > { %2425 = vmatprep.mubr.msk.f32.mxu1 %vm651_vm8, %v649_v27  ;;  %v978_v27 = vld [vmem:[#allocation6 + $0x1] sm:$0x1] }
 0x36b   : > { %v574_v40 = vadd.f32 %v573_v39, %v572_v29 }
 0x36d   : > { %v650_v37 = vpop.trf.xlu1  ;;  %v575_v41 = vrot.slane %v574_v40, 1 }
 0x36e   : > { %2426 = vmatmul.mubr.msk.f32.gmra.mrb[14].mxu1 %vm651_vm8, %v650_v37 }
 0x36f   : > { %2692 = vmatpush3.bf16.xpose.msk.msra.mxu1 %vm3278_vm5, %v3338_v30  ;;  %2460 = vmatprep.mubr.msk.f32.mxu1 %vm3012_vm6, %v3013_v23  ;;  %v576_v48 = vadd.f32 %v575_v41, %v574_v40 }
 0x376   : > { %2461 = vmatmul.mubr.msk.f32.vlgmr.msra.gmra.mrb[16].mxu1 %vm402_vm4, %v894_v28 }
 0x37d   : > { %v970_v21 = vpop.permute.xlu1 %969 }
 0x37e   : > { %v972_v20 = vsel %vm402_vm4, %v970_v21, 0.0 }
 0x38e   : > { %v564_v43 = vpop.permute.xlu1 %563 }
 0x38f   : > { %v569_v44 = vrot.slane %v564_v43, %v3356_v47 }
 0x391   : > { %v570_v46 = vmul.f32 %v569_v44, %v560_v42 }
 0x393   : > { %v577_v22 = vadd.f32 %v576_v48, %v570_v46 }
 0x395   : > { %578 = vst [vmem:[#allocation2] sm:$0x1] %v577_v22 }
 0x409   : > { %v3426_v30 = vpop.f32.mrb[0].mxu1 }
 0x40a   : > { %v3428_v23 = vpop.f32.mrb[1].mxu1 }
 0x411   : > { %v3430_v49 = vpop.f32.mrb[2].mxu1 }
 0x412   : > { %v3432_v50 = vpop.f32.mrb[3].mxu1 }
 0x419   : > { %v3434_v51 = vpop.f32.mrb[4].mxu1 }
 0x41a   : > { %v3436_v53 = vpop.f32.mrb[5].mxu1 }
 0x421   : > { %v3438_v54 = vpop.f32.mrb[6].mxu1 }
 0x422   : > { %v3440_v55 = vpop.f32.mrb[7].mxu1 }
 0x429   : > { %v3442_v56 = vpop.f32.mrb[8].mxu1 }
 0x42a   : > { %v3444_v57 = vpop.f32.mrb[9].mxu1 }
 0x431   : > { %v3446_v58 = vpop.f32.mrb[10].mxu1 }
 0x432   : > { %v3448_v59 = vpop.f32.mrb[11].mxu1 }
 0x439   : > { %v3450_v60 = vpop.f32.mrb[12].mxu1 }
 0x43a   : > { %v3452_v62 = vpop.f32.mrb[13].mxu1 }
 0x441   : > { %v3454_v63 = vpop.f32.mrb[14].mxu1 }
 0x442   : > { %v3456_v18 = vpop.f32.mrb[15].mxu1 }
 0x449   : > { %v963_v19 = vpop.f32.mrb[16].mxu1 }
 0x44a   : > { %v2462_v31 = vpop.f32.mrb[17].mxu1  ;;  %v976_v32 = vsel %vm350_vm0, %v963_v19, -1e+30 }
 0x44b   : > { %979 = vmax.xlane.f32.xlu0 %v976_v32 }
 0x44f   : > { %973 = vadd.xlane.f32.xlu0 %v972_v20 }
 0x4d8   : > { %v980_v33 = vpop.xlane.xlu0 %979 }
 0x4d9   : > { %v981_v24 = vrot.slane %v980_v33, 4 }
 0x4db   : > { %v982_v34 = vmax.f32 %v980_v33, %v981_v24 }
 0x4dc   : > { %v974_v41 = vpop.xlane.xlu0 %973 }
 0x4dd   : > { %v983_v25 = vrot.slane %v982_v34, 2  ;;  %v975_v42 = vmul.f32 0.125, %v974_v41  ;;  %v3016_v41 = vmov 1966171168  }
 0x4df   : > { %v984_v35 = vmax.f32 %v982_v34, %v983_v25  ;;  %v993_v43 = vsub.f32 %v963_v19, %v975_v42  ;;  %v1340_v42 = vunpack.c.l.s4 %v3016_v41  ;;  %v585_v41 = vld [vmem:[#allocation3 + $0x30] sm:$0xff] }
 0x4e1   : > { %v985_v26 = vrot.slane %v984_v35, 1 }
 0x4e3   : > { %v986_v36 = vmax.f32 %v984_v35, %v985_v26  ;;  %v1007_v35 = vld [vmem:[#allocation2 + $0x1] sm:$0x1] }
 0x4e5   : > { %2809 = vpush %v986_v36 }
 0x516   : > { %s2810_s11 = spop %2809 }
 0x517   : > { %v988_v37 = vstv %s2810_s11 }
 0x518   : > { %v989_v28 = vmax.f32 %v978_v27, %v988_v37  ;;  %v1331_v37 = vsel %vm1330_vm9, %v3366_v52, 0.0 }
 0x51a   : > { %v990_v38 = vsub.f32 %v978_v27, %v989_v28  ;;  %1358 = vst.msk [vmem:[#allocation6 + $0x1] sm:$0x1] %vm888_vm7, %v989_v28  ;;  %v998_v29 = vrot.slane %v989_v28, %v3356_v47  ;;  %v1332_v28 = vrot.slane %v1331_v37, 4 }
 0x51c   : > { %v991_v39 = vmul.f32 1.442695, %v990_v38  ;;  %1000 = vperm.xlu0 %2896, %v998_v29   ;;  %v1333_v38 = vadd.f32 %v1332_v28, %v1331_v37  ;;  %v598_v29 = vrot.slane %v3372_v61, %v3356_v47  ;;  %v579_v28 = vld [vmem:[#allocation3] sm:$0xff] }
 0x51e   : > { %2901 = vpow2.f32 %v991_v39  ;;  %v1334_v39 = vrot.slane %v1333_v38, 2 }
 0x520   : > { %1100 = vrot.lane.b32.xlu0 %v3366_v52, %s3015_s23 }
 0x528   : > { %v2902_v21 = vpop.eup %2901 }
 0x529   : > { %1010 = vperm.xlu1 %2895, %v2902_v21   ;;  %v1046_v40 = vrot.slane %v2902_v21, %v3356_v47  ;;  %v1335_v21 = vadd.f32 %v1334_v39, %v1333_v38  ;;  %v580_v38 = vld [vmem:[#allocation3 + $0x8] sm:$0xff]  ;;  %v582_v39 = vld [vmem:[#allocation3 + $0x18] sm:$0xff] }
 0x52d   : > { %1048 = vperm.xlu1 %2895, %v1046_v40   ;;  %v1336_v40 = vrot.slane %v1335_v21, 1 }
 0x59b   : > { %v1001_v44 = vpop.permute.xlu0 %1000 }
 0x59c   : > { %v1003_v46 = vsub.f32 %v993_v43, %v1001_v44  ;;  %v1337_v43 = vadd.f32 %v1336_v40, %v1335_v21  ;;  %v1341_v44 = vunpack.c.0.s8 %v1340_v42  ;;  %v583_v21 = vld [vmem:[#allocation3 + $0x20] sm:$0xff]  ;;  %v584_v40 = vld [vmem:[#allocation3 + $0x28] sm:$0xff]  ;;  %v586_v42 = vld [vmem:[#allocation3 + $0x38] sm:$0xff] }
 0x59e   : > { %v1004_v48 = vmul.f32 1.442695, %v1003_v46  ;;  %v1344_v46 = vsub.s32 %v1341_v44, %v3353_v45  ;;  %v588_v44 = vld [vmem:[#allocation3 + $0x48] sm:$0xff] }
 0x59f   : > { %v1101_v22 = vpop.permute.xlu0 %1100 }
 0x5a0   : > { %2903 = vpow2.f32 %v1004_v48  ;;  %2463 = vmatprep.subr.mxu0 %v1101_v22  ;;  %2805 = vmatprep.subr.mxu1 %v1101_v22  ;;  %v1345_v48 = vrot.slane %v1337_v43, %v1344_v46  ;;  %v587_v43 = vld [vmem:[#allocation3 + $0x40] sm:$0xff] }
 0x5a1   : > { %2464 = vmatpush3.msra.mxu0 %v1101_v22  ;;  %2806 = vmatpush3.msra.mxu1 %v1101_v22 }
 0x5a2   : > { %v1352_v22 = vrot.slane %v1345_v48, %v1344_v46  ;;  %v589_v46 = vld [vmem:[#allocation3 + $0x50] sm:$0xff]  ;;  %v590_v48 = vld [vmem:[#allocation3 + $0x58] sm:$0xff] }
 0x5a4   : > { %1353 = vrot.lane.b32.xlu1 %v1352_v22, %s3015_s23  ;;  %v591_v22 = vld [vmem:[#allocation3 + $0x60] sm:$0xff] }
 0x5a8   : > { %v1011_v33 = vpop.permute.xlu1 %1010 }
 0x5a9   : > { %v1016_v34 = vrot.slane %v1011_v33, %v3356_v47 }
 0x5aa   : > { %v2904_v31 = vpop.eup %2903 }
 0x5ab   : > { %v1018_v32 = vrot.slane %v2904_v31, 4  ;;  %1067 = vxpose.xlu0.b32.start.end [1/1] (short) %v2904_v31, 128  ;;  %v1017_v26 = vmul.f32 %v1016_v34, %v1007_v35 }
 0x5ad   : > { %v1019_v20 = vadd.f32 %v2904_v31, %v1018_v32 }
 0x5af   : > { %v1020_v24 = vrot.slane %v1019_v20, 2 }
 0x5b1   : > { %v1021_v25 = vadd.f32 %v1020_v24, %v1019_v20 }
 0x5b3   : > { %v1022_v19 = vrot.slane %v1021_v25, 1 }
 0x5b5   : > { %v1023_v36 = vadd.f32 %v1022_v19, %v1021_v25 }
 0x5b7   : > { %v1024_v27 = vadd.f32 %v1023_v36, %v1017_v26 }
 0x5b9   : > { %1025 = vst [vmem:[#allocation2 + $0x1] sm:$0x1] %v1024_v27 }
 0x610   : > { %600 = vperm.xlu0 %2896, %v598_v29   ;;  %v581_v29 = vld [vmem:[#allocation3 + $0x10] sm:$0xff] }
 0x62b   : > { %v1083_v31 = vpop.trf.xlu0 }
 0x62c   : > { %2465 = vmatprep.mubr.msk.f32.mxu0 %vm651_vm8, %v1083_v31 }
 0x62f   : > { %v1084_v32 = vpop.trf.xlu0 }
 0x630   : > { %2466 = vmatmul.mubr.msk.f32.vlgmr.msra.gmra.mrb[2].mxu0 %vm651_vm8, %v1084_v32  ;;  %v592_v32 = vld [vmem:[#allocation3 + $0x68] sm:$0xff] }
 0x633   : > { %v1085_v47 = vpop.trf.xlu0 }
 0x634   : > { %2468 = vmatprep.mubr.msk.f32.mxu0 %vm651_vm8, %v1085_v47  ;;  %v593_v47 = vld [vmem:[#allocation3 + $0x70] sm:$0xff] }
 0x637   : > { %v1086_v61 = vpop.trf.xlu0 }
 0x638   : > { %2469 = vmatmul.mubr.msk.f32.gmra.mrb[4].mxu0 %vm651_vm8, %v1086_v61  ;;  %v594_v61 = vld [vmem:[#allocation3 + $0x78] sm:$0xff] }
 0x63b   : > { %v1087_v20 = vpop.trf.xlu0 }
 0x63c   : > { %2471 = vmatprep.mubr.msk.f32.mxu0 %vm651_vm8, %v1087_v20 }
 0x63f   : > { %v1088_v45 = vpop.trf.xlu0 }
 0x640   : > { %2472 = vmatmul.mubr.msk.f32.gmra.mrb[6].mxu0 %vm651_vm8, %v1088_v45 }
 0x643   : > { %v1089_v33 = vpop.trf.xlu0 }
 0x644   : > { %2474 = vmatprep.mubr.msk.f32.mxu0 %vm651_vm8, %v1089_v33 }
 0x647   : > { %v1090_v24 = vpop.trf.xlu0 }
 0x648   : > { %2475 = vmatmul.mubr.msk.f32.gmra.mrb[8].mxu0 %vm651_vm8, %v1090_v24 }
 0x64b   : > { %v1091_v34 = vpop.trf.xlu0 }
 0x64c   : > { %2477 = vmatprep.mubr.msk.f32.mxu0 %vm651_vm8, %v1091_v34 }
 0x64f   : > { %v1092_v25 = vpop.trf.xlu0 }
 0x650   : > { %2478 = vmatmul.mubr.msk.f32.gmra.mrb[10].mxu0 %vm651_vm8, %v1092_v25 }
 0x653   : > { %v1093_v35 = vpop.trf.xlu0 }
 0x654   : > { %2480 = vmatprep.mubr.msk.f32.mxu1 %vm651_vm8, %v1093_v35 }
 0x657   : > { %v1094_v19 = vpop.trf.xlu0 }
 0x658   : > { %2481 = vmatmul.mubr.msk.f32.vlgmr.msra.gmra.mrb[18].mxu1 %vm651_vm8, %v1094_v19 }
 0x65b   : > { %v1095_v26 = vpop.trf.xlu0 }
 0x65c   : > { %2483 = vmatprep.mubr.msk.f32.mxu1 %vm651_vm8, %v1095_v26 }
 0x65f   : > { %v1096_v36 = vpop.trf.xlu0 }
 0x660   : > { %2484 = vmatmul.mubr.msk.f32.gmra.mrb[20].mxu1 %vm651_vm8, %v1096_v36 }
 0x663   : > { %v1097_v27 = vpop.trf.xlu0 }
 0x664   : > { %2486 = vmatprep.mubr.msk.f32.mxu1 %vm651_vm8, %v1097_v27 }
 0x667   : > { %v1098_v37 = vpop.trf.xlu0 }
 0x668   : > { %2487 = vmatmul.mubr.msk.f32.gmra.mrb[22].mxu1 %vm651_vm8, %v1098_v37 }
 0x68f   : > { %v601_v31 = vpop.permute.xlu0 %600 }
 0x690   : > { %v603_v20 = vmul.f32 %v601_v31, %v579_v28  ;;  %v604_v45 = vmul.f32 %v601_v31, %v580_v38  ;;  %v605_v33 = vmul.f32 %v601_v31, %v581_v29  ;;  %v606_v24 = vmul.f32 %v601_v31, %v582_v39 }
 0x691   : > { %v607_v34 = vmul.f32 %v601_v31, %v583_v21  ;;  %v608_v25 = vmul.f32 %v601_v31, %v584_v40  ;;  %v609_v35 = vmul.f32 %v601_v31, %v585_v41  ;;  %v610_v19 = vmul.f32 %v601_v31, %v586_v42 }
 0x692   : > { %v611_v26 = vmul.f32 %v601_v31, %v587_v43  ;;  %v612_v36 = vmul.f32 %v601_v31, %v588_v44  ;;  %v613_v27 = vmul.f32 %v601_v31, %v589_v46  ;;  %v614_v37 = vmul.f32 %v601_v31, %v590_v48 }
 0x693   : > { %v615_v3 = vmul.f32 %v601_v31, %v591_v22  ;;  %v616_v10 = vmul.f32 %v601_v31, %v592_v32  ;;  %v617_v17 = vmul.f32 %v601_v31, %v593_v47  ;;  %v618_v16 = vmul.f32 %v601_v31, %v594_v61  ;;  %v1030_v22 = vld [vmem:[#allocation3 + $0x98] sm:$0xff]  ;;  %v1029_v31 = vld [vmem:[#allocation3 + $0x90] sm:$0xff] }
 0x694   : > { %v845_v15 = vadd.f32 %v3428_v23, %v603_v20  ;;  %v846_v14 = vadd.f32 %v3426_v30, %v604_v45  ;;  %v847_v28 = vadd.f32 %v3432_v50, %v605_v33  ;;  %v848_v38 = vadd.f32 %v3430_v49, %v606_v24  ;;  %v1032_v24 = vld [vmem:[#allocation3 + $0xa8] sm:$0xff] }
 0x695   : > { %v849_v29 = vadd.f32 %v3436_v53, %v607_v34  ;;  %v850_v39 = vadd.f32 %v3434_v51, %v608_v25  ;;  %v851_v21 = vadd.f32 %v3440_v55, %v609_v35  ;;  %v852_v40 = vadd.f32 %v3438_v54, %v610_v19  ;;  %v3522_v54 = vpop.permute.xlu1 %1048  ;;  %v1031_v34 = vld [vmem:[#allocation3 + $0xa0] sm:$0xff] }
 0x696   : > { %v853_v41 = vadd.f32 %v3444_v57, %v611_v26  ;;  %v854_v42 = vadd.f32 %v3442_v56, %v612_v36  ;;  %v855_v23 = vadd.f32 %v3448_v59, %v613_v27  ;;  %v856_v30 = vadd.f32 %v3446_v58, %v614_v37  ;;  %861 = vst.msk [vmem:[#allocation3] sm:$0xff] %vm402_vm4, %v845_v15  ;;  %v877_v56 = vld [vmem:[#allocation5] sm:$0x1]  ;;  %v1329_v57 = vld [vmem:[#allocation5 + $0x1] sm:$0x1]  ;;  %v1034_v37 = vld [vmem:[#allocation3 + $0xb8] sm:$0xff] }
 0x697   : > { %862 = vst.msk [vmem:[#allocation3 + $0x8] sm:$0xff] %vm402_vm4, %v846_v14  ;;  %863 = vst.msk [vmem:[#allocation3 + $0x10] sm:$0xff] %vm402_vm4, %v847_v28  ;;  %v857_v49 = vadd.f32 %v3452_v62, %v615_v3  ;;  %v858_v50 = vadd.f32 %v3450_v60, %v616_v10  ;;  %v859_v51 = vadd.f32 %v3456_v18, %v617_v17  ;;  %v878_v3 = vsel %vm402_vm4, %v3366_v52, 0.0  ;;  %v1028_v62 = vld [vmem:[#allocation3 + $0x88] sm:$0xff]  ;;  %v1033_v28 = vld [vmem:[#allocation3 + $0xb0] sm:$0xff] }
 0x698   : > { %864 = vst.msk [vmem:[#allocation3 + $0x18] sm:$0xff] %vm402_vm4, %v848_v38  ;;  %v860_v53 = vadd.f32 %v3454_v63, %v618_v16  ;;  %865 = vst.msk [vmem:[#allocation3 + $0x20] sm:$0xff] %vm402_vm4, %v849_v29  ;;  %v879_v10 = vrot.slane %v878_v3, 4  ;;  %v1027_v63 = vld [vmem:[#allocation3 + $0x80] sm:$0xff]  ;;  %v1052_v52 = vmul.f32 %v3522_v54, %v1028_v62  ;;  %v1054_v32 = vmul.f32 %v3522_v54, %v1030_v22 }
 0x699   : > { %866 = vst.msk [vmem:[#allocation3 + $0x28] sm:$0xff] %vm402_vm4, %v850_v39  ;;  %867 = vst.msk [vmem:[#allocation3 + $0x30] sm:$0xff] %vm402_vm4, %v851_v21  ;;  %v1354_v58 = vpop.permute.xlu1 %1353  ;;  %v1051_v43 = vmul.f32 %v3522_v54, %v1027_v63  ;;  %v1053_v61 = vmul.f32 %v3522_v54, %v1029_v31  ;;  %v1056_v25 = vmul.f32 %v3522_v54, %v1032_v24 }
 0x69a   : > { %868 = vst.msk [vmem:[#allocation3 + $0x38] sm:$0xff] %vm402_vm4, %v852_v40  ;;  %869 = vst.msk [vmem:[#allocation3 + $0x40] sm:$0xff] %vm402_vm4, %v853_v41  ;;  %v880_v14 = vadd.f32 %v879_v10, %v878_v3  ;;  %v1356_v60 = vadd.f32 %v1354_v58, %v1329_v57  ;;  %v1055_v19 = vmul.f32 %v3522_v54, %v1031_v34  ;;  %v1038_v10 = vld [vmem:[#allocation3 + $0xd8] sm:$0xff]  ;;  %v1040_v58 = vld [vmem:[#allocation3 + $0xe8] sm:$0xff] }
 0x69b   : > { %870 = vst.msk [vmem:[#allocation3 + $0x48] sm:$0xff] %vm402_vm4, %v854_v42  ;;  %871 = vst.msk [vmem:[#allocation3 + $0x50] sm:$0xff] %vm402_vm4, %v855_v23  ;;  %v1058_v38 = vmul.f32 %v3522_v54, %v1034_v37  ;;  %v1057_v39 = vmul.f32 %v3522_v54, %v1033_v28  ;;  %v1036_v42 = vld [vmem:[#allocation3 + $0xc8] sm:$0xff]  ;;  %v1035_v23 = vld [vmem:[#allocation3 + $0xc0] sm:$0xff] }
 0x69c   : > { %872 = vst.msk [vmem:[#allocation3 + $0x58] sm:$0xff] %vm402_vm4, %v856_v30  ;;  %873 = vst.msk [vmem:[#allocation3 + $0x60] sm:$0xff] %vm402_vm4, %v857_v49  ;;  %v881_v15 = vrot.slane %v880_v14, 2  ;;  %v1060_v30 = vmul.f32 %v3522_v54, %v1036_v42 }
 0x69d   : > { %874 = vst.msk [vmem:[#allocation3 + $0x68] sm:$0xff] %vm402_vm4, %v858_v50  ;;  %875 = vst.msk [vmem:[#allocation3 + $0x70] sm:$0xff] %vm402_vm4, %v859_v51  ;;  %v1059_v50 = vmul.f32 %v3522_v54, %v1035_v23 }
 0x69e   : > { %876 = vst.msk [vmem:[#allocation3 + $0x78] sm:$0xff] %vm402_vm4, %v860_v53  ;;  %v882_v16 = vadd.f32 %v881_v15, %v880_v14  ;;  %v1037_v14 = vld [vmem:[#allocation3 + $0xd0] sm:$0xff]  ;;  %v1062_v15 = vmul.f32 %v3522_v54, %v1038_v10 }
 0x69f   : > { %1357 = vst.msk [vmem:[#allocation5 + $0x1] sm:$0x1] %vm886_vm10, %v1356_v60  ;;  %v1064_v60 = vmul.f32 %v3522_v54, %v1040_v58 }
 0x6a0   : > { %v883_v17 = vrot.slane %v882_v16, 1 }
 0x6a2   : > { %v884_v55 = vadd.f32 %v883_v17, %v882_v16  ;;  %v1061_v17 = vmul.f32 %v3522_v54, %v1037_v14 }
 0x6a4   : > { %v885_v59 = vadd.f32 %v884_v55, %v877_v56 }
 0x6a6   : > { %887 = vst.msk [vmem:[#allocation5] sm:$0x1] %vm886_vm10, %v885_v59  ;;  %v1039_v59 = vld [vmem:[#allocation3 + $0xe0] sm:$0xff] }
 0x6a7   : > { %v1063_v63 = vmul.f32 %v3522_v54, %v1039_v59 }
 0x703   : > { %v2467_v18 = vpop.f32.mrb[2].mxu0 }
 0x704   : > { %v1297_v44 = vadd.f32 %v2467_v18, %v1052_v52  ;;  %v1217_v46 = vpop.f32.mrb[3].mxu0 }
 0x705   : > { %v1296_v48 = vadd.f32 %v1217_v46, %v1051_v43  ;;  %v1041_v46 = vld [vmem:[#allocation3 + $0xf0] sm:$0xff] }
 0x706   : > { %1313 = vst.msk [vmem:[#allocation3 + $0x88] sm:$0xff] %vm402_vm4, %v1297_v44  ;;  %v1042_v44 = vld [vmem:[#allocation3 + $0xf8] sm:$0xff]  ;;  %v1065_v31 = vmul.f32 %v3522_v54, %v1041_v46 }
 0x707   : > { %1312 = vst.msk [vmem:[#allocation3 + $0x80] sm:$0xff] %vm402_vm4, %v1296_v48  ;;  %v1066_v48 = vmul.f32 %v3522_v54, %v1042_v44 }
 0x70b   : > { %v2470_v47 = vpop.f32.mrb[4].mxu0 }
 0x70c   : > { %v1299_v20 = vadd.f32 %v2470_v47, %v1054_v32  ;;  %v1227_v45 = vpop.f32.mrb[5].mxu0 }
 0x70d   : > { %v1298_v33 = vadd.f32 %v1227_v45, %v1053_v61 }
 0x70e   : > { %1315 = vst.msk [vmem:[#allocation3 + $0x98] sm:$0xff] %vm402_vm4, %v1299_v20 }
 0x70f   : > { %1314 = vst.msk [vmem:[#allocation3 + $0x90] sm:$0xff] %vm402_vm4, %v1298_v33 }
 0x713   : > { %v2473_v35 = vpop.f32.mrb[6].mxu0 }
 0x714   : > { %v1301_v26 = vadd.f32 %v2473_v35, %v1056_v25  ;;  %v1237_v36 = vpop.f32.mrb[7].mxu0 }
 0x715   : > { %v1300_v27 = vadd.f32 %v1237_v36, %v1055_v19 }
 0x716   : > { %1317 = vst.msk [vmem:[#allocation3 + $0xa8] sm:$0xff] %vm402_vm4, %v1301_v26 }
 0x717   : > { %1316 = vst.msk [vmem:[#allocation3 + $0xa0] sm:$0xff] %vm402_vm4, %v1300_v27 }
 0x71b   : > { %v2476_v29 = vpop.f32.mrb[8].mxu0 }
 0x71c   : > { %v1303_v21 = vadd.f32 %v2476_v29, %v1058_v38  ;;  %v1247_v40 = vpop.f32.mrb[9].mxu0 }
 0x71d   : > { %v1302_v41 = vadd.f32 %v1247_v40, %v1057_v39 }
 0x71e   : > { %1319 = vst.msk [vmem:[#allocation3 + $0xb8] sm:$0xff] %vm402_vm4, %v1303_v21 }
 0x71f   : > { %1318 = vst.msk [vmem:[#allocation3 + $0xb0] sm:$0xff] %vm402_vm4, %v1302_v41 }
 0x723   : > { %v2479_v49 = vpop.f32.mrb[10].mxu0 }
 0x724   : > { %v1305_v51 = vadd.f32 %v2479_v49, %v1060_v30  ;;  %v1257_v53 = vpop.f32.mrb[11].mxu0 }
 0x725   : > { %v1304_v3 = vadd.f32 %v1257_v53, %v1059_v50 }
 0x726   : > { %1321 = vst.msk [vmem:[#allocation3 + $0xc8] sm:$0xff] %vm402_vm4, %v1305_v51 }
 0x727   : > { %1320 = vst.msk [vmem:[#allocation3 + $0xc0] sm:$0xff] %vm402_vm4, %v1304_v3 }
 0x72b   : > { %v2482_v16 = vpop.f32.mrb[18].mxu1 }
 0x72c   : > { %v1307_v55 = vadd.f32 %v2482_v16, %v1062_v15  ;;  %v1267_v56 = vpop.f32.mrb[19].mxu1 }
 0x72d   : > { %v1306_v57 = vadd.f32 %v1267_v56, %v1061_v17 }
 0x72e   : > { %1323 = vst.msk [vmem:[#allocation3 + $0xd8] sm:$0xff] %vm402_vm4, %v1307_v55 }
 0x72f   : > { %1322 = vst.msk [vmem:[#allocation3 + $0xd0] sm:$0xff] %vm402_vm4, %v1306_v57 }
 0x733   : > { %v2485_v62 = vpop.f32.mrb[20].mxu1 }
 0x734   : > { %v1309_v52 = vadd.f32 %v2485_v62, %v1064_v60  ;;  %v1277_v18 = vpop.f32.mrb[21].mxu1 }
 0x735   : > { %v1308_v43 = vadd.f32 %v1277_v18, %v1063_v63 }
 0x736   : > { %1325 = vst.msk [vmem:[#allocation3 + $0xe8] sm:$0xff] %vm402_vm4, %v1309_v52 }
 0x737   : > { %1324 = vst.msk [vmem:[#allocation3 + $0xe0] sm:$0xff] %vm402_vm4, %v1308_v43 }
 0x73b   : > { %v2488_v22 = vpop.f32.mrb[22].mxu1 }
 0x73c   : > { %v1311_v32 = vadd.f32 %v2488_v22, %v1066_v48  ;;  %v1287_v47 = vpop.f32.mrb[23].mxu1 }
 0x73d   : > { %v1310_v61 = vadd.f32 %v1287_v47, %v1065_v31 }
 0x73e   : > { %1327 = vst.msk [vmem:[#allocation3 + $0xf8] sm:$0xff] %vm402_vm4, %v1311_v32 }
 0x73f   : > { %1326 = vst.msk [vmem:[#allocation3 + $0xf0] sm:$0xff] %vm402_vm4, %v1310_v61 }
 0x740 PF: > { %1361 = sbr.rel (%p2118_p0) target bundleno = 1890 (0x762), region = 48  ;;  %v1362_v20 = vld [vmem:[#allocation2] sm:$0x1] (!%p2118_p0)  ;;  %v1382_v45 = vld [vmem:[#allocation5] sm:$0x1] (!%p2118_p0)  ;;  %v3830_v33 = vlaneseq (!%p2118_p0)  ;;  %v1367_v19 = vld [vmem:[#allocation3 + $0x8] sm:$0xff] (!%p2118_p0) }
 0x741   : > { %v1363_v34 = vadd.f32 (!%p2118_p0), 0.0008, %v1362_v20  ;;  %v1383_v25 = vmul.f32 (!%p2118_p0), 0.0001, %v1382_v45  ;;  %v1366_v35 = vld [vmem:[#allocation3] sm:$0xff] (!%p2118_p0)  ;;  %v1368_v36 = vld [vmem:[#allocation3 + $0x10] sm:$0xff] (!%p2118_p0) }
 0x742   : > { %v3559_v24 = vshrl.u32 (!%p2118_p0), %v3830_v33, 7  ;;  %v1369_v27 = vld [vmem:[#allocation3 + $0x18] sm:$0xff] (!%p2118_p0)  ;;  %v1370_v37 = vld [vmem:[#allocation3 + $0x20] sm:$0xff] (!%p2118_p0)  ;;  %v1371_v38 = vld [vmem:[#allocation3 + $0x28] sm:$0xff] (!%p2118_p0)  ;;  %vm1422_vm11 = vcmask (!%p2118_p0), 130048  }
 0x743   : > { %v1364_v26 = vmul.f32 (!%p2118_p0), 0.15075567, %v1363_v34  ;;  %v1372_v29 = vld [vmem:[#allocation3 + $0x30] sm:$0xff] (!%p2118_p0)  ;;  %v1373_v39 = vld [vmem:[#allocation3 + $0x38] sm:$0xff] (!%p2118_p0)  ;;  %v1374_v21 = vld [vmem:[#allocation3 + $0x40] sm:$0xff] (!%p2118_p0) }
 0x744   : > { %v1387_v54 = vsub.s32 (!%p2118_p0), 0, %v3559_v24  ;;  %v1375_v40 = vld [vmem:[#allocation3 + $0x48] sm:$0xff] (!%p2118_p0)  ;;  %v1376_v41 = vld [vmem:[#allocation3 + $0x50] sm:$0xff] (!%p2118_p0)  ;;  %v1377_v50 = vld [vmem:[#allocation3 + $0x58] sm:$0xff] (!%p2118_p0) }
 0x745   : > { %1365 = vst [vmem:[#allocation2] sm:$0x1] (!%p2118_p0), %v1364_v26  ;;  %v1378_v51 = vld [vmem:[#allocation3 + $0x60] sm:$0xff] (!%p2118_p0)  ;;  %v1379_v53 = vld [vmem:[#allocation3 + $0x68] sm:$0xff] (!%p2118_p0)  ;;  %v1380_v16 = vld [vmem:[#allocation3 + $0x70] sm:$0xff] (!%p2118_p0) }
 0x746   : > { %v1388_v28 = vrot.slane (!%p2118_p0), %v1383_v25, %v1387_v54  ;;  %v1381_v17 = vld [vmem:[#allocation3 + $0x78] sm:$0xff] (!%p2118_p0)  ;;  %v1462_v33 = vld [vmem:[#allocation5 + $0x1] sm:$0x1] (!%p2118_p0) }
 0x747   : > { %v1440_v55 = vld [vmem:[#allocation2 + $0x1] sm:$0x1] }
 0x748   : > { %v1390_v42 = vadd.f32 %v1388_v28, %v1366_v35  ;;  %v1391_v23 = vadd.f32 %v1388_v28, %v1367_v19  ;;  %v1392_v30 = vadd.f32 %v1388_v28, %v1368_v36  ;;  %v1393_v49 = vadd.f32 %v1388_v28, %v1369_v27  ;;  %v1445_v27 = vld [vmem:[#allocation3 + $0x80] sm:$0xff]  ;;  %v1460_v24 = vld [vmem:[#allocation3 + $0xf8] sm:$0xff] }
 0x749   : > { %v1394_v3 = vadd.f32 %v1388_v28, %v1370_v37  ;;  %v1395_v10 = vadd.f32 %v1388_v28, %v1371_v38  ;;  %v1396_v14 = vadd.f32 %v1388_v28, %v1372_v29  ;;  %v1397_v15 = vadd.f32 %v1388_v28, %v1373_v39  ;;  %v1447_v38 = vld [vmem:[#allocation3 + $0x90] sm:$0xff]  ;;  %v1448_v29 = vld [vmem:[#allocation3 + $0x98] sm:$0xff]  ;;  %v1449_v39 = vld [vmem:[#allocation3 + $0xa0] sm:$0xff] }
 0x74a   : > { %v1406_v56 = vmul.f32 0.15075567, %v1390_v42  ;;  %v1407_v57 = vmul.f32 0.15075567, %v1391_v23  ;;  %v1408_v58 = vmul.f32 0.15075567, %v1392_v30  ;;  %v1398_v59 = vadd.f32 %v1388_v28, %v1374_v21 }
 0x74b   : > { %v1409_v60 = vmul.f32 0.15075567, %v1393_v49  ;;  %v1410_v62 = vmul.f32 0.15075567, %v1394_v3  ;;  %v1411_v63 = vmul.f32 0.15075567, %v1395_v10  ;;  %v1399_v52 = vadd.f32 %v1388_v28, %v1375_v40 }
 0x74c   : > { %1423 = vst.msk [vmem:[#allocation4] sm:$0xff] %vm1422_vm11, %v1406_v56  ;;  %1424 = vst.msk [vmem:[#allocation4 + $0x8] sm:$0xff] %vm1422_vm11, %v1407_v57  ;;  %v1412_v18 = vmul.f32 0.15075567, %v1396_v14  ;;  %v1413_v43 = vmul.f32 0.15075567, %v1397_v15  ;;  %v1400_v46 = vadd.f32 %v1388_v28, %v1376_v41  ;;  %v1401_v22 = vadd.f32 %v1388_v28, %v1377_v50 }
 0x74d   : > { %1425 = vst.msk [vmem:[#allocation4 + $0x10] sm:$0xff] %vm1422_vm11, %v1408_v58  ;;  %v1414_v44 = vmul.f32 0.15075567, %v1398_v59  ;;  %1426 = vst.msk [vmem:[#allocation4 + $0x18] sm:$0xff] %vm1422_vm11, %v1409_v60  ;;  %v1415_v48 = vmul.f32 0.15075567, %v1399_v52  ;;  %v1402_v31 = vadd.f32 %v1388_v28, %v1378_v51  ;;  %v1403_v32 = vadd.f32 %v1388_v28, %v1379_v53 }
 0x74e   : > { %1427 = vst.msk [vmem:[#allocation4 + $0x20] sm:$0xff] %vm1422_vm11, %v1410_v62  ;;  %1428 = vst.msk [vmem:[#allocation4 + $0x28] sm:$0xff] %vm1422_vm11, %v1411_v63  ;;  %v1416_v47 = vmul.f32 0.15075567, %v1400_v46  ;;  %v1404_v61 = vadd.f32 %v1388_v28, %v1380_v16  ;;  %v1405_v20 = vadd.f32 %v1388_v28, %v1381_v17  ;;  %v1441_v45 = vadd.f32 0.0008, %v1440_v55 }
 0x74f   : > { %1429 = vst.msk [vmem:[#allocation4 + $0x30] sm:$0xff] %vm1422_vm11, %v1412_v18  ;;  %1430 = vst.msk [vmem:[#allocation4 + $0x38] sm:$0xff] %vm1422_vm11, %v1413_v43  ;;  %v1417_v34 = vmul.f32 0.15075567, %v1401_v22  ;;  %v1418_v25 = vmul.f32 0.15075567, %v1402_v31 }
 0x750   : > { %1431 = vst.msk [vmem:[#allocation4 + $0x40] sm:$0xff] %vm1422_vm11, %v1414_v44  ;;  %1432 = vst.msk [vmem:[#allocation4 + $0x48] sm:$0xff] %vm1422_vm11, %v1415_v48  ;;  %v1419_v35 = vmul.f32 0.15075567, %v1403_v32  ;;  %v1420_v19 = vmul.f32 0.15075567, %v1404_v61 }
 0x751   : > { %1433 = vst.msk [vmem:[#allocation4 + $0x50] sm:$0xff] %vm1422_vm11, %v1416_v47  ;;  %v1421_v26 = vmul.f32 0.15075567, %v1405_v20  ;;  %v1442_v36 = vmul.f32 0.15075567, %v1441_v45  ;;  %1434 = vst.msk [vmem:[#allocation4 + $0x58] sm:$0xff] %vm1422_vm11, %v1417_v34 }
 0x752   : > { %1435 = vst.msk [vmem:[#allocation4 + $0x60] sm:$0xff] %vm1422_vm11, %v1418_v25  ;;  %1436 = vst.msk [vmem:[#allocation4 + $0x68] sm:$0xff] %vm1422_vm11, %v1419_v35  ;;  %v1463_v37 = vmul.f32 0.0001, %v1462_v33  ;;  %v1446_v28 = vld [vmem:[#allocation3 + $0x88] sm:$0xff]  ;;  %v1451_v41 = vld [vmem:[#allocation3 + $0xb0] sm:$0xff] }
 0x753   : > { %1437 = vst.msk [vmem:[#allocation4 + $0x70] sm:$0xff] %vm1422_vm11, %v1420_v19  ;;  %1438 = vst.msk [vmem:[#allocation4 + $0x78] sm:$0xff] %vm1422_vm11, %v1421_v26  ;;  %v1450_v40 = vld [vmem:[#allocation3 + $0xa8] sm:$0xff]  ;;  %v1452_v42 = vld [vmem:[#allocation3 + $0xb8] sm:$0xff] }
 0x754   : > { %1443 = vst [vmem:[#allocation2 + $0x1] sm:$0x1] %v1442_v36  ;;  %v1468_v21 = vrot.slane %v1463_v37, %v1387_v54  ;;  %v1453_v23 = vld [vmem:[#allocation3 + $0xc0] sm:$0xff]  ;;  %v1454_v30 = vld [vmem:[#allocation3 + $0xc8] sm:$0xff]  ;;  %v1455_v3 = vld [vmem:[#allocation3 + $0xd0] sm:$0xff] }
 0x755   : > { %v1456_v10 = vld [vmem:[#allocation3 + $0xd8] sm:$0xff]  ;;  %v1457_v14 = vld [vmem:[#allocation3 + $0xe0] sm:$0xff]  ;;  %v1458_v56 = vld [vmem:[#allocation3 + $0xe8] sm:$0xff] }
 0x756   : > { %v1470_v49 = vadd.f32 %v1468_v21, %v1445_v27  ;;  %v1471_v50 = vadd.f32 %v1468_v21, %v1446_v28  ;;  %v1472_v51 = vadd.f32 %v1468_v21, %v1447_v38  ;;  %v1473_v53 = vadd.f32 %v1468_v21, %v1448_v29  ;;  %v1459_v57 = vld [vmem:[#allocation3 + $0xf0] sm:$0xff] }
 0x757   : > { %v1474_v15 = vadd.f32 %v1468_v21, %v1449_v39  ;;  %v1475_v16 = vadd.f32 %v1468_v21, %v1450_v40  ;;  %v1476_v17 = vadd.f32 %v1468_v21, %v1451_v41  ;;  %v1477_v55 = vadd.f32 %v1468_v21, %v1452_v42 }
 0x758   : > { %v1486_v54 = vmul.f32 0.15075567, %v1470_v49  ;;  %v1487_v58 = vmul.f32 0.15075567, %v1471_v50  ;;  %v1488_v59 = vmul.f32 0.15075567, %v1472_v51  ;;  %v1478_v60 = vadd.f32 %v1468_v21, %v1453_v23 }
 0x759   : > { %v1489_v62 = vmul.f32 0.15075567, %v1473_v53  ;;  %v1490_v63 = vmul.f32 0.15075567, %v1474_v15  ;;  %v1491_v52 = vmul.f32 0.15075567, %v1475_v16  ;;  %v1479_v18 = vadd.f32 %v1468_v21, %v1454_v30 }
 0x75a   : > { %1503 = vst.msk [vmem:[#allocation4 + $0x80] sm:$0xff] %vm1422_vm11, %v1486_v54  ;;  %1504 = vst.msk [vmem:[#allocation4 + $0x88] sm:$0xff] %vm1422_vm11, %v1487_v58  ;;  %v1492_v43 = vmul.f32 0.15075567, %v1476_v17  ;;  %v1493_v44 = vmul.f32 0.15075567, %v1477_v55  ;;  %v1480_v48 = vadd.f32 %v1468_v21, %v1455_v3  ;;  %v1481_v31 = vadd.f32 %v1468_v21, %v1456_v10 }
 0x75b   : > { %1505 = vst.msk [vmem:[#allocation4 + $0x90] sm:$0xff] %vm1422_vm11, %v1488_v59  ;;  %v1494_v46 = vmul.f32 0.15075567, %v1478_v60  ;;  %1506 = vst.msk [vmem:[#allocation4 + $0x98] sm:$0xff] %vm1422_vm11, %v1489_v62  ;;  %v1495_v22 = vmul.f32 0.15075567, %v1479_v18  ;;  %v1482_v32 = vadd.f32 %v1468_v21, %v1457_v14  ;;  %v1483_v47 = vadd.f32 %v1468_v21, %v1458_v56 }
 0x75c   : > { %1507 = vst.msk [vmem:[#allocation4 + $0xa0] sm:$0xff] %vm1422_vm11, %v1490_v63  ;;  %1508 = vst.msk [vmem:[#allocation4 + $0xa8] sm:$0xff] %vm1422_vm11, %v1491_v52  ;;  %v1496_v61 = vmul.f32 0.15075567, %v1480_v48  ;;  %v1484_v20 = vadd.f32 %v1468_v21, %v1459_v57  ;;  %v1485_v45 = vadd.f32 %v1468_v21, %v1460_v24  ;;  %v1497_v33 = vmul.f32 0.15075567, %v1481_v31 }
 0x75d   : > { %1509 = vst.msk [vmem:[#allocation4 + $0xb0] sm:$0xff] %vm1422_vm11, %v1492_v43  ;;  %1510 = vst.msk [vmem:[#allocation4 + $0xb8] sm:$0xff] %vm1422_vm11, %v1493_v44  ;;  %v1498_v34 = vmul.f32 0.15075567, %v1482_v32  ;;  %v1499_v25 = vmul.f32 0.15075567, %v1483_v47 }
 0x75e   : > { %1511 = vst.msk [vmem:[#allocation4 + $0xc0] sm:$0xff] %vm1422_vm11, %v1494_v46  ;;  %1512 = vst.msk [vmem:[#allocation4 + $0xc8] sm:$0xff] %vm1422_vm11, %v1495_v22  ;;  %v1500_v35 = vmul.f32 0.15075567, %v1484_v20  ;;  %v1501_v19 = vmul.f32 0.15075567, %v1485_v45 }
 0x75f   : > { %1513 = vst.msk [vmem:[#allocation4 + $0xd0] sm:$0xff] %vm1422_vm11, %v1496_v61  ;;  %1514 = vst.msk [vmem:[#allocation4 + $0xd8] sm:$0xff] %vm1422_vm11, %v1497_v33 }
 0x760   : > { %1515 = vst.msk [vmem:[#allocation4 + $0xe0] sm:$0xff] %vm1422_vm11, %v1498_v34  ;;  %1516 = vst.msk [vmem:[#allocation4 + $0xe8] sm:$0xff] %vm1422_vm11, %v1499_v25 }
 0x761   : > { %1517 = vst.msk [vmem:[#allocation4 + $0xf0] sm:$0xff] %vm1422_vm11, %v1500_v35  ;;  %1518 = vst.msk [vmem:[#allocation4 + $0xf8] sm:$0xff] %vm1422_vm11, %v1501_v19 }
 0x762 PF: > { %p2187_p2 = scmp.lt.s32.totalorder %s2991_s18, 1 }
 0x763   : > { %vm1524_vm12 = vcmask (!%p2187_p2), 130048   ;;  %v3601_v26 = vpack.c.bf16 (!%p2187_p2), %v3127_v1, %v3122_v0  ;;  %v3017_v36 = vmov (!%p2187_p2), 0.0|0.0   ;;  %v1523_v37 = vld [vmem:[%s3215_s6] sm:$0xff] (!%p2187_p2)  ;;  %vm3018_vm14 = vmmov (!%p2187_p2), 0   ;;  %v1679_v39 = vld [vmem:[#allocation4 + $0x8] sm:$0xff] (!%p2187_p2)  ;;  %v1680_v21 = vld [vmem:[#allocation4 + $0x10] sm:$0xff] (!%p2187_p2) }
 0x764   : > { %1522 = sbr.rel (%p2187_p2) target bundleno = 3098 (0xc1a), region = 52  ;;  %2693 = vmatprep.subr.bf16.mxu0 (!%p2187_p2), %v3017_v36  ;;  %vm3606_vm13 = vmpackc.low (!%p2187_p2), %vm1524_vm12, %vm1524_vm12  ;;  %2725 = vmatprep.subr.bf16.mxu1 (!%p2187_p2), %v3017_v36  ;;  %v3019_v0 = vmov (!%p2187_p2), 0.0   ;;  %v1646_v1 = vmul.f32 (!%p2187_p2), %v1523_v37, %v1523_v37  ;;  %v3623_v38 = vpack.c.bf16 (!%p2187_p2), %v3140_v4, %v3132_v2  ;;  %v3631_v29 = vpack.c.bf16 (!%p2187_p2), %v3150_v6, %v3145_v5  ;;  %v3833_v6 = vld [vmem:[#allocation13_spill] sm:$0xff] (!%p2187_p2)  ;;  %s3020_s6 = smov (!%p2187_p2), 112   ;;  %v1683_v30 = vld [vmem:[#allocation4 + $0x28] sm:$0xff] (!%p2187_p2) }
 0x765   : > { %2696 = vmatpush3.bf16.xpose.msk.msra.mxu0 (!%p2187_p2), %vm3606_vm13, %v3601_v26  ;;  %2521 = vmatprep.mubr.msk.f32.mxu0 (!%p2187_p2), %vm3018_vm14, %v3019_v0  ;;  %v3639_v2 = vpack.c.bf16 (!%p2187_p2), %v3160_v8, %v3155_v7  ;;  %v3647_v4 = vpack.c.bf16 (!%p2187_p2), %v3176_v11, %v3165_v9  ;;  %v3655_v5 = vpack.c.bf16 (!%p2187_p2), %v3186_v13, %v3181_v12  ;;  %v3834_v7 = vld [vmem:[#allocation14_spill] sm:$0xff] (!%p2187_p2)  ;;  %v3835_v9 = vld [vmem:[#allocation15_spill] sm:$0xff] (!%p2187_p2)  ;;  %v3836_v11 = vld [vmem:[#allocation16_spill] sm:$0xff] (!%p2187_p2)  ;;  %s3021_s12 = smov (!%p2187_p2), 16   ;;  %vm1969_vm15 = vcmask (!%p2187_p2), 261248  }
 0x766   : > { %2697 = vmatprep.subr.bf16.mxu0 (!%p2187_p2), %v3017_v36  ;;  %2556 = vmatprep.mubr.msk.f32.mxu1 (!%p2187_p2), %vm3018_vm14, %v3019_v0  ;;  %v1647_v28 = vsel (!%p2187_p2), %vm1524_vm12, %v1646_v1, 0.0  ;;  %v3663_v8 = vpack.c.bf16 (!%p2187_p2), %v3834_v7, %v3833_v6  ;;  %v3671_v12 = vpack.c.bf16 (!%p2187_p2), %v3836_v11, %v3835_v9  ;;  %v1678_v13 = vld [vmem:[#allocation4] sm:$0xff] (!%p2187_p2)  ;;  %v1681_v41 = vld [vmem:[#allocation4 + $0x18] sm:$0xff] (!%p2187_p2)  ;;  %v1684_v50 = vld [vmem:[#allocation4 + $0x30] sm:$0xff] (!%p2187_p2) }
 0x767   : > { %1648 = vadd.xlane.f32.xlu0 (!%p2187_p2), %v1647_v28  ;;  %1768 = vrot.lane.b32.xlu1 (!%p2187_p2), %v1523_v37, %s3020_s6  ;;  %v2726_v40 = vpack.c.bf16 (!%p2187_p2), %v1679_v39, %v1678_v13  ;;  %v2729_v42 = vpack.c.bf16 (!%p2187_p2), %v1681_v41, %v1680_v21  ;;  %v1682_v23 = vld [vmem:[#allocation4 + $0x20] sm:$0xff] (!%p2187_p2)  ;;  %v1685_v51 = vld [vmem:[#allocation4 + $0x38] sm:$0xff] (!%p2187_p2)  ;;  %v1687_v10 = vld [vmem:[#allocation4 + $0x48] sm:$0xff] (!%p2187_p2) }
 0x768   : > { %v2732_v49 = vpack.c.bf16 (!%p2187_p2), %v1683_v30, %v1682_v23  ;;  %v2735_v53 = vpack.c.bf16 (!%p2187_p2), %v1685_v51, %v1684_v50  ;;  %v1686_v3 = vld [vmem:[#allocation4 + $0x40] sm:$0xff] (!%p2187_p2)  ;;  %v1688_v56 = vld [vmem:[#allocation4 + $0x50] sm:$0xff] (!%p2187_p2)  ;;  %v1689_v57 = vld [vmem:[#allocation4 + $0x58] sm:$0xff] (!%p2187_p2) }
 0x769   : > { %2727 = vmatpush3.bf16.msra.mxu1 (!%p2187_p2), %v2726_v40  ;;  %v2738_v14 = vpack.c.bf16 (!%p2187_p2), %v1687_v10, %v1686_v3  ;;  %v2741_v24 = vpack.c.bf16 (!%p2187_p2), %v1689_v57, %v1688_v56  ;;  %v1690_v54 = vld [vmem:[#allocation4 + $0x60] sm:$0xff] (!%p2187_p2)  ;;  %v1691_v58 = vld [vmem:[#allocation4 + $0x68] sm:$0xff] (!%p2187_p2)  ;;  %v1692_v60 = vld [vmem:[#allocation4 + $0x70] sm:$0xff] (!%p2187_p2) }
 0x76a   : > { %2728 = vmatprep.subr.bf16.mxu1 (!%p2187_p2), %v3017_v36  ;;  %v2744_v59 = vpack.c.bf16 (!%p2187_p2), %v1691_v58, %v1690_v54  ;;  %v1693_v62 = vld [vmem:[#allocation4 + $0x78] sm:$0xff] (!%p2187_p2)  ;;  %v1878_v45 = vld [vmem:[#allocation4 + $0x80] sm:$0xff] (!%p2187_p2)  ;;  %v1879_v33 = vld [vmem:[#allocation4 + $0x88] sm:$0xff] (!%p2187_p2) }
 0x76b   : > { %1844 = vrot.lane.b32.xlu1 %v1646_v1, %s3020_s6  ;;  %v2747_v63 = vpack.c.bf16 %v1693_v62, %v1692_v60  ;;  %v1880_v34 = vld [vmem:[#allocation4 + $0x90] sm:$0xff]  ;;  %v2782_v25 = vpack.c.bf16 %v1879_v33, %v1878_v45  ;;  %v1881_v35 = vld [vmem:[#allocation4 + $0x98] sm:$0xff]  ;;  %v1886_v6 = vld [vmem:[#allocation4 + $0xc0] sm:$0xff] }
 0x76c   : > { %v2785_v19 = vpack.c.bf16 %v1881_v35, %v1880_v34  ;;  %v1887_v7 = vld [vmem:[#allocation4 + $0xc8] sm:$0xff]  ;;  %v1888_v9 = vld [vmem:[#allocation4 + $0xd0] sm:$0xff]  ;;  %v1889_v11 = vld [vmem:[#allocation4 + $0xd8] sm:$0xff] }
 0x76d   : > { %2700 = vmatpush3.bf16.xpose.msk.msra.mxu0 %vm3606_vm13, %v3623_v38  ;;  %2730 = vmatpush3.bf16.msra.mxu1 %v2729_v42  ;;  %v1890_v13 = vld [vmem:[#allocation4 + $0xe0] sm:$0xff]  ;;  %v1891_v39 = vld [vmem:[#allocation4 + $0xe8] sm:$0xff]  ;;  %v1892_v40 = vld [vmem:[#allocation4 + $0xf0] sm:$0xff] }
 0x76e   : > { %2701 = vmatprep.subr.bf16.mxu0 %v3017_v36  ;;  %2731 = vmatprep.subr.bf16.mxu1 %v3017_v36  ;;  %v2800_v21 = vpack.c.bf16 %v1891_v39, %v1890_v13  ;;  %v1893_v41 = vld [vmem:[#allocation4 + $0xf8] sm:$0xff] }
 0x76f   : > { %v2803_v42 = vpack.c.bf16 %v1893_v41, %v1892_v40  ;;  %v2205_v56 = vld [vmem:[#allocation2] ss:$0 sm:$0xff] }
 0x771   : > { %2733 = vmatpush3.bf16.msra.mxu1 %v2732_v49 }
 0x772   : > { %2734 = vmatprep.subr.bf16.mxu1 %v3017_v36 }
 0x775   : > { %2704 = vmatpush3.bf16.xpose.msk.msra.mxu0 %vm3606_vm13, %v3631_v29  ;;  %2736 = vmatpush3.bf16.msra.mxu1 %v2735_v53 }
 0x776   : > { %2705 = vmatprep.subr.bf16.mxu0 %v3017_v36  ;;  %2737 = vmatprep.subr.bf16.mxu1 %v3017_v36 }
 0x779   : > { %2739 = vmatpush3.bf16.msra.mxu1 %v2738_v14 }
 0x77a   : > { %2740 = vmatprep.subr.bf16.mxu1 %v3017_v36 }
 0x77d   : > { %2708 = vmatpush3.bf16.xpose.msk.msra.mxu0 %vm3606_vm13, %v3639_v2  ;;  %2742 = vmatpush3.bf16.msra.mxu1 %v2741_v24 }
 0x77e   : > { %2709 = vmatprep.subr.bf16.mxu0 %v3017_v36  ;;  %2743 = vmatprep.subr.bf16.mxu1 %v3017_v36 }
 0x781   : > { %2745 = vmatpush3.bf16.msra.mxu1 %v2744_v59 }
 0x782   : > { %2746 = vmatprep.subr.bf16.mxu1 %v3017_v36 }
 0x785   : > { %2712 = vmatpush3.bf16.xpose.msk.msra.mxu0 %vm3606_vm13, %v3647_v4  ;;  %2748 = vmatpush3.bf16.msra.mxu1 %v2747_v63 }
 0x786   : > { %2713 = vmatprep.subr.bf16.mxu0 %v3017_v36  ;;  %2749 = vmatprep.subr.bf16.mxu1 %v3017_v36 }
 0x78d   : > { %2716 = vmatpush3.bf16.xpose.msk.msra.mxu0 %vm3606_vm13, %v3655_v5 }
 0x78e   : > { %2717 = vmatprep.subr.bf16.mxu0 %v3017_v36 }
 0x795   : > { %2720 = vmatpush3.bf16.xpose.msk.msra.mxu0 %vm3606_vm13, %v3663_v8 }
 0x796   : > { %2721 = vmatprep.subr.bf16.mxu0 %v3017_v36 }
 0x79d   : > { %2724 = vmatpush3.bf16.xpose.msk.msra.mxu0 %vm3606_vm13, %v3671_v12 }
 0x79e   : > { %2781 = vmatprep.subr.bf16.mxu0 %v3017_v36 }
 0x7a4   : > { %2522 = vmatmul.mubr.msk.f32.vlgmr.msra.gmra.mrb[0].mxu0 %vm1524_vm12, %v1523_v37  ;;  %v1883_v37 = vld [vmem:[#allocation4 + $0xa8] sm:$0xff] }
 0x7a5   : > { %2626 = vmatprep.mubr.msk.f32.mxu0 %vm3018_vm14, %v3019_v0  ;;  %2783 = vmatpush3.bf16.msra.mxu0 %v2782_v25 }
 0x7a6   : > { %2784 = vmatprep.subr.bf16.mxu0 %v3017_v36 }
 0x7a9   : > { %2786 = vmatpush3.bf16.msra.mxu0 %v2785_v19 }
 0x7aa   : > { %2787 = vmatprep.subr.bf16.mxu0 %v3017_v36 }
 0x7d9   : > { %v1769_v52 = vpop.permute.xlu1 %1768 }
 0x7dd   : > { %v1845_v18 = vpop.permute.xlu1 %1844 }
 0x7de   : > { %v1847_v43 = vsel %vm1524_vm12, %v1845_v18, 0.0 }
 0x7f4   : > { %v1649_v44 = vpop.xlane.xlu0 %1648 }
 0x7f5   : > { %v1650_v46 = vmul.f32 0.125, %v1649_v44 }
 0x877   : > { %v1642_v15 = vpop.f32.mrb[0].mxu0 }
 0x878   : > { %v2523_v16 = vpop.f32.mrb[1].mxu0  ;;  %v1653_v55 = vsel %vm350_vm0, %v1642_v15, -1e+30  ;;  %v1656_v48 = vsub.f32 %v1642_v15, %v1650_v46  ;;  %v2224_v15 = vld [vmem:[#allocation2 + $0x1] ss:$0 sm:$0xff] }
 0x879   : > { %1654 = vmax.xlane.f32.xlu0 %v1653_v55 }
 0x87d   : > { %1848 = vadd.xlane.f32.xlu0 %v1847_v43 }
 0x906   : > { %v1655_v22 = vpop.xlane.xlu0 %1654 }
 0x907   : > { %v1657_v31 = vsub.f32 %v1656_v48, %v1655_v22 }
 0x909   : > { %v1658_v32 = vadd.f32 -1.8920949, %v1657_v31 }
 0x90a   : > { %v1849_v23 = vpop.xlane.xlu0 %1848 }
 0x90b   : > { %v1659_v47 = vmul.f32 1.442695, %v1658_v32  ;;  %v1850_v30 = vmul.f32 0.125, %v1849_v23 }
 0x90d   : > { %2905 = vpow2.f32 %v1659_v47 }
 0x917   : > { %v2906_v61 = vpop.eup %2905 }
 0x918   : > { %v3691_v20 = vadd.f32 1.5075567e-05, %v2906_v61 }
 0x91a   : > { %2557 = vmatmul.mubr.msk.f32.vlgmr.msra.gmra.mrb[0].mxu1 %vm350_vm0, %v3691_v20  ;;  %v1662_v55 = vsel %vm350_vm0, %v3691_v20, 0.0 }
 0x91b   : > { %2752 = vmatpush3.bf16.xpose.msk.msra.mxu1 %vm3606_vm13, %v3601_v26  ;;  %2591 = vmatprep.mubr.msk.f32.mxu1 %vm3018_vm14, %v3019_v0  ;;  %v1882_v26 = vld [vmem:[#allocation4 + $0xa0] sm:$0xff]  ;;  %v1670_v57 = vmul.f32 %v2205_v56, %v1662_v55 }
 0x91c   : > { %2753 = vmatprep.subr.bf16.mxu1 %v3017_v36  ;;  %v2788_v0 = vpack.c.bf16 %v1883_v37, %v1882_v26 }
 0x91e   : > { %2789 = vmatpush3.bf16.msra.mxu0 %v2788_v0 }
 0x91f   : > { %2790 = vmatprep.subr.bf16.mxu0 %v3017_v36 }
 0x923   : > { %2756 = vmatpush3.bf16.xpose.msk.msra.mxu1 %vm3606_vm13, %v3623_v38 }
 0x924   : > { %2757 = vmatprep.subr.bf16.mxu1 %v3017_v36 }
 0x92b   : > { %2760 = vmatpush3.bf16.xpose.msk.msra.mxu1 %vm3606_vm13, %v3631_v29 }
 0x92c   : > { %2761 = vmatprep.subr.bf16.mxu1 %v3017_v36 }
 0x933   : > { %2764 = vmatpush3.bf16.xpose.msk.msra.mxu1 %vm3606_vm13, %v3639_v2  ;;  %v1884_v2 = vld [vmem:[#allocation4 + $0xb0] sm:$0xff] }
 0x934   : > { %2765 = vmatprep.subr.bf16.mxu1 %v3017_v36 }
 0x93b   : > { %2768 = vmatpush3.bf16.xpose.msk.msra.mxu1 %vm3606_vm13, %v3647_v4  ;;  %v1885_v4 = vld [vmem:[#allocation4 + $0xb8] sm:$0xff] }
 0x93c   : > { %2769 = vmatprep.subr.bf16.mxu1 %v3017_v36 }
 0x943   : > { %2772 = vmatpush3.bf16.xpose.msk.msra.mxu1 %vm3606_vm13, %v3655_v5  ;;  %v2791_v5 = vpack.c.bf16 %v1885_v4, %v1884_v2 }
 0x944   : > { %2773 = vmatprep.subr.bf16.mxu1 %v3017_v36 }
 0x945   : > { %2792 = vmatpush3.bf16.msra.mxu0 %v2791_v5 }
 0x946   : > { %2793 = vmatprep.subr.bf16.mxu0 %v3017_v36 }
 0x94b   : > { %2776 = vmatpush3.bf16.xpose.msk.msra.mxu1 %vm3606_vm13, %v3663_v8  ;;  %v2794_v8 = vpack.c.bf16 %v1887_v7, %v1886_v6 }
 0x94c   : > { %2777 = vmatprep.subr.bf16.mxu1 %v3017_v36 }
 0x94d   : > { %2795 = vmatpush3.bf16.msra.mxu0 %v2794_v8 }
 0x94e   : > { %2796 = vmatprep.subr.bf16.mxu0 %v3017_v36 }
 0x953   : > { %2780 = vmatpush3.bf16.xpose.msk.msra.mxu1 %vm3606_vm13, %v3671_v12  ;;  %v2797_v12 = vpack.c.bf16 %v1889_v11, %v1888_v9 }
 0x955   : > { %2798 = vmatpush3.bf16.msra.mxu0 %v2797_v12 }
 0x956   : > { %2799 = vmatprep.subr.bf16.mxu0 %v3017_v36 }
 0x959   : > { %2801 = vmatpush3.bf16.msra.mxu0 %v2800_v21 }
 0x95a   : > { %2592 = vmatmul.mubr.msk.f32.vlgmr.msra.gmra.mrb[2].mxu1 %vm1524_vm12, %v1769_v52  ;;  %2802 = vmatprep.subr.bf16.mxu0 %v3017_v36 }
 0x95d   : > { %2804 = vmatpush3.bf16.msra.mxu0 %v2803_v42 }
 0x9ed   : > { %v1760_v27 = vpop.f32.mrb[0].mxu1 }
 0x9ee   : > { %v2558_v1 = vpop.f32.mrb[1].mxu1 }
 0xa2d   : > { %v1838_v28 = vpop.f32.mrb[2].mxu1 }
 0xa2e   : > { %v2593_v38 = vpop.f32.mrb[3].mxu1  ;;  %v1851_v29 = vsel %vm350_vm0, %v1838_v28, -1e+30  ;;  %v1854_v49 = vsub.f32 %v1838_v28, %v1850_v30 }
 0xa2f   : > { %1852 = vmax.xlane.f32.xlu1 %v1851_v29 }
 0xabc   : > { %v1853_v50 = vpop.xlane.xlu1 %1852 }
 0xabd   : > { %v1855_v51 = vsub.f32 %v1854_v49, %v1853_v50 }
 0xabf   : > { %v1856_v53 = vadd.f32 -1.8920949, %v1855_v51 }
 0xac1   : > { %v1857_v3 = vmul.f32 1.442695, %v1856_v53 }
 0xac3   : > { %2907 = vpow2.f32 %v1857_v3 }
 0xacd   : > { %v2908_v10 = vpop.eup %2907 }
 0xace   : > { %v1859_v14 = vadd.f32 1.5075567e-05, %v2908_v10 }
 0xad0   : > { %2627 = vmatmul.mubr.msk.f32.vlgmr.msra.gmra.mrb[2].mxu0 %vm350_vm0, %v1859_v14  ;;  %v1860_v36 = vsel %vm350_vm0, %v1859_v14, 0.0 }
 0xad1   : > { %v1869_v16 = vmul.f32 %v2224_v15, %v1860_v36 }
 0xad3   : > { %1870 = vadd.xlane.f32.xlu0 %v1869_v16 }
 0xad7   : > { %1671 = vadd.xlane.f32.xlu0 %v1670_v57 }
 0xb60   : > { %v1871_v24 = vpop.xlane.xlu0 %1870 }
 0xb61   : > { %v1872_v18 = vadd.f32 1e-06, %v1871_v24 }
 0xb64   : > { %v1672_v54 = vpop.xlane.xlu0 %1671 }
 0xb65   : > { %v1673_v58 = vadd.f32 1e-06, %v1672_v54 }
 0xb67   : > { %2909 = vrcp.f32 %v1673_v58 }
 0xb68   : > { %2911 = vrcp.f32 %v1872_v18 }
 0xb71   : > { %v2910_v59 = vpop.eup %2909 }
 0xb72   : > { %v1675_v60 = vmul.f32 %v2910_v59, %v1673_v58  ;;  %v2912_v17 = vpop.eup %2911 }
 0xb73   : > { %v1874_v43 = vmul.f32 %v2912_v17, %v1872_v18 }
 0xb74   : > { %v1676_v62 = vsub.f32 2.0, %v1675_v60 }
 0xb75   : > { %v1875_v44 = vsub.f32 2.0, %v1874_v43 }
 0xb76   : > { %v1677_v63 = vmul.f32 %v2910_v59, %v1676_v62 }
 0xb77   : > { %v1876_v46 = vmul.f32 %v2912_v17, %v1875_v44 }
 0xb78   : > { %v1764_v52 = vmul.f32 %v1760_v27, %v1677_v63 }
 0xb7a   : > { %1765 = vst.msk [vmem:[%s3229_s3] sm:$0xff] %vm1524_vm12, %v1764_v52 }
 0xba3   : > { %v1960_v48 = vpop.f32.mrb[2].mxu0 }
 0xba4   : > { %v1964_v22 = vmul.f32 %v1960_v48, %v1876_v46  ;;  %v2628_v31 = vpop.f32.mrb[3].mxu0 }
 0xba6   : > { %1966 = vrot.lane.b32.xlu0 %v1964_v22, %s3021_s12 }
 0xc18   : > { %v1967_v32 = vpop.permute.xlu0 %1966 }
 0xc19   : > { %1970 = vst.msk [vmem:[%s3229_s3] sm:$0xff] %vm1969_vm15, %v1967_v32 }
 0xc1a PF: > { %s2227_s14 = sadd.s32 4294967295, %s2991_s18  ;;  %s1989_s24 = sshll.u32 %s3229_s3, 4  ;;  %s3752_s24 = int_to_ptr.vmem [resolvable:$true] %s1989_s24 }
 0xc1b   : > { %p1980_p3 = scmp.gt.s32.totalorder %s2227_s14, 0  ;;  %s3838_s13 = sand.u32 1, %s2983_s16  }
 0xc1c   : > { %s1972_s26 = scalar_lea.sflag [#allocation8], %s3838_s13  ;;  %s2913_s23 = scalar_lea.vmem %s3752_s24, 128 }
 0xc1d   : > { %s3857_s14 = smov (!%p1980_p3, %s2227_s14), 0  ;;  %p2914_p4 = scmp.ne.s32.totalorder %s3752_s24, %s2913_s23 }
 0xc1e   : > { %s1985_s27 = sadd.s32 %s2995_s19, %s3857_s14  ;;  %s3022_s3 = smov [#allocation7]  }
 0xc1f   : > { %s2228_s28 = sshll.u32 %s1985_s27, 7  ;;  %p2915_p6 = pnand %p2914_p4, %p3104_p5 }
 0xc20   : > { %s1987_s25 = scalar_lea.hbm %s3807_s4, %s2228_s28  ;;  %s2917_s18 = sshll.u32 %s3022_s3, 4  ;;  %s2918_s18 = int_to_ptr.vmem [resolvable:$false] %s2917_s18 }
 0xc21   : > { %p2916_p7 = pneg %p2915_p6  ;;  %s2919_s19 = scalar_lea.vmem %s2918_s18, 256 }
 0xc22   : > { %p2920_p8 = scmp.lt.s32.totalorder %s3752_s24, %s2918_s18  ;;  %p2921_p9 = scmp.lt.s32.totalorder %s2919_s19, %s2913_s23 }
 0xc24   : > { %p2922_p11 = por %p2921_p9, %p2920_p8 }
 0xc26   : > { %p2923_p12 = pnand %p2922_p11, %p2916_p7 }
 0xc28   : > { %2926 = shalt.err (!%p2923_p12)
}
 0xc29   : > { %s2927_s10 = scalar_lea.hbm %s1987_s25, 128  ;;  %s2931_s6 = scalar_lea.hbm %s3807_s4, 256 }
 0xc2a   : > { %p2928_p13 = scmp.ne.s32.totalorder %s1987_s25, %s2927_s10  ;;  %p2932_p2 = scmp.lt.u32.totalorder %s1987_s25, %s3807_s4 }
 0xc2b   : > { %p2933_p3 = scmp.lt.u32.totalorder %s2931_s6, %s2927_s10  ;;  %p2935_p6 = scmp.lt.u32.totalorder %s2927_s10, %s1987_s25 }
 0xc2c   : > { %p2929_p0 = pnand %p2928_p13, %p3104_p5 }
 0xc2d   : > { %p2934_p4 = por %p2933_p3, %p2932_p2 }
 0xc2e   : > { %p2930_p1 = pneg %p2929_p0 }
 0xc2f   : > { %p2936_p8 = por %p2935_p6, %p2934_p4 }
 0xc31   : > { %p2937_p7 = pnand %p2936_p8, %p2930_p1 }
 0xc33   : > { %2940 = shalt.err (!%p2937_p7)
}
 0xc34   : > { %2811 = dma.vmem_to_hbm [thread:$0]  (%p3104_p5), %s3752_s24, 128, %s1987_s25, %s1972_s26  }
 0xc35 PF: > { %p2817_p9 = scmp.ge.s32.totalorder %s3007_s22, 2  ;;  %s2001_s27 = sand.u32 1, %s2979_s15  }
 0xc36   : > { %s2002_s28 = scalar_lea.sflag [#allocation8], %s2001_s27 }
 0xc37   : > { %p2814_p11 = pnand %p2817_p9, %p3113_p10 }
 0xc39   : > { %2974 = dma.done.wait (!%p2814_p11), %s2002_s28, 128  }
 0xc3a   : > { %2976 = vsyncadd (!%p2814_p11), %s2002_s28, 4294967168  ;;  %s17_s22 = sadd.s32 1, %s3007_s22   ;;  %s3839_s29 = sld [smem:[#allocation10_spill]] }
 0xc3b   : > { %p14_p12 = scmp.ge.s32.totalorder %s17_s22, 6   ;;  %s3840_s24 = sld [smem:[#allocation11_spill]] }
 0xc3c   : > { %s3841_s15 = smov %s2983_s16  ;;  %s3842_s16 = smov %s2987_s17 }
 0xc3d   : > { %s3843_s17 = smov %s3111_s30  ;;  %s3844_s18 = smov %s2999_s20 }
 0xc3e   : > { %s3845_s19 = smov %s3003_s21  ;;  %16 = sbr.rel (!%p14_p12) target bundleno = 7 (0x7), region = 103 }
 0xc40   : > { %s3846_s20 = smov %s3839_s29 }
 0xc41   : > { %s3847_s21 = smov %s3840_s24 }
 0xc45   :  { %2007 = vsyncpa [#allocation8], 1 }
 0xc46   :  { %2009 = vsyncpa [#allocation8 + $0x1], 1 }

</bundles_post_ra>
